<compile_context>
chip_gen: v6e
topology: v6e:2x2x1
jax: 0.10.0
libtpu: 0.0.40
codegen_flags: <defaults>
</compile_context>

<pallas_src>
import math

import jax
import jax.numpy as jnp
from jax.experimental import pallas as pl
from jax.experimental.pallas import tpu as pltpu

# ----------------------------- hyperparameters -----------------------------
INNER_DIM = 128                      # inner_dim
HEAD_DIM = 64                        # head_dim = min(64, inner_dim)
N_HEADS = INNER_DIM // HEAD_DIM      # 2
DEPTH = 2
FF_MULT = 4
FF_DIM = INNER_DIM * FF_MULT
NUM_TOKENS = 200
MAX_SEQ_LEN = 64
MAX_LINES = 32
LINE_SEP_ID = 5                      # LineEmbedding default ('\n' token id)
SCALENORM_EPS = 1e-5
EMB_SCALE = INNER_DIM ** -0.5        # pos/line/time embedding scale
ATTN_SCALE = HEAD_DIM ** -0.5        # 0.125 == 2**-3 -> folding into wq is exact in bf16
NEG_INF = -1e30


# ------------------------------- kernel math --------------------------------
def _scalenorm(h, g):
    # x-transformers ScaleNorm: x / clamp(||x|| * D^-0.5, eps) * g.
    # Written with an EUP rsqrt: max(sqrt(a), eps) == sqrt(max(a, eps^2)) for a>=0.
    ms = jnp.sum(h * h, axis=-1, keepdims=True) * (1.0 / INNER_DIM)
    inv = jax.lax.rsqrt(jnp.maximum(ms, SCALENORM_EPS * SCALENORM_EPS))
    return h * (inv * g)


def encoder_kernel(g_ref, x_ref, bias_ref,
                   wqkv_ref, wo_ref, bo_ref, w1_ref, b1_ref, w2_ref, b2_ref,
                   out_ref):
    """Pre-norm ScaleNorm transformer encoder; `batch_block` sequences per grid step.

    x_ref is the flattened (batch_block*S, D) row block; bias_ref is the additive
    key-padding bias (batch_block, 1, S) with 0 = attend, -1e30 = padding.
    """
    R, D = x_ref.shape                  # R = batch_block * S rows
    BB = bias_ref.shape[0]
    S = bias_ref.shape[2]

    x = x_ref[...]                      # (R, D) float32 residual stream
    # Hoisted ONCE (used 2 heads x 2 layers): additive key-padding bias broadcast
    # to full score shape -- JAX does not CSE broadcast_in_dim.
    bias_b = jnp.broadcast_to(bias_ref[...], (BB, S, S))

    for l in range(DEPTH):
        # ---- ScaleNorm -> fused QKV projection -> attention -> K=128 O-proj ----
        h = _scalenorm(x, g_ref[2 * l]).astype(jnp.bfloat16)
        qkv = jnp.dot(h, wqkv_ref[l], preferred_element_type=jnp.float32)   # (R, 3D) f32
        qkv = qkv.reshape(BB, S, 3 * D).astype(jnp.bfloat16)                # rows split only

        o_heads = []
        for hd in range(N_HEADS):
            c = hd * HEAD_DIM
            q_h = qkv[..., c:c + HEAD_DIM]                                  # (BB,S,64) bf16
            k_h = qkv[..., D + c:D + c + HEAD_DIM]
            v_h = qkv[..., 2 * D + c:2 * D + c + HEAD_DIM]
            dots = jax.lax.dot_general(                                     # (BB,S,S) f32
                q_h, k_h, (((2,), (2,)), ((0,), (0,))),
                preferred_element_type=jnp.float32)
            dots = dots + bias_b                                            # key padding (additive)
            dots = dots - jnp.max(dots, axis=-1, keepdims=True)
            p = jnp.exp(dots)
            p = p * pl.reciprocal(jnp.sum(p, axis=-1, keepdims=True), approx=True)
            o_h = jax.lax.dot_general(                                      # (BB,S,64) f32
                p.astype(jnp.bfloat16), v_h, (((2,), (1,)), ((0,), (0,))),
                preferred_element_type=jnp.float32)
            o_heads.append(o_h.reshape(R, HEAD_DIM))
        # lane-pack both heads into one (R,128) buffer -> single K=128 wo matmul
        o = jnp.concatenate(o_heads, axis=-1).astype(jnp.bfloat16)          # (R, D) bf16
        x = x + jnp.dot(o, wo_ref[l], preferred_element_type=jnp.float32) + bo_ref[l]

        # ---- ScaleNorm -> feed-forward (GELU) -> residual ----
        h = _scalenorm(x, g_ref[2 * l + 1]).astype(jnp.bfloat16)
        h1 = jnp.dot(h, w1_ref[l], preferred_element_type=jnp.float32) + b1_ref[l]
        # TODO(synk): PyTorch nn.GELU() is exact (erf); tanh approximation used here.
        h1 = jax.nn.gelu(h1, approximate=True).astype(jnp.bfloat16)
        x = x + jnp.dot(h1, w2_ref[l], preferred_element_type=jnp.float32) + b2_ref[l]

    # final ScaleNorm of the pre-norm stack (lane-dense (R, 128) output)
    out_ref[...] = _scalenorm(x, g_ref[2 * DEPTH])


# ------------------------------ pallas wrapper -------------------------------
def _largest_divisor_leq(n, cap):
    for d in range(max(1, min(n, cap)), 0, -1):
        if n % d == 0:
            return d
    return 1


def pick_batch_block(B, S, min_grid_steps=2, max_rows_per_step=2048):
    """Chip-aware default row blocking.

    Targets as many rows per grid step as the VMEM budget allows (big M for the
    MXU, amortized per-step overhead) while always keeping >= `min_grid_steps`
    "parallel" grid steps so both of v7x's TensorCores get work.  On v5e/v6e the
    extra grid step costs ~0.35us; pass min_grid_steps=1 to collapse to one step.
    """
    cap = max(1, max_rows_per_step // S)              # per-step VMEM / v7x ceiling
    cap = min(cap, max(1, B // min_grid_steps))       # keep >= min_grid_steps steps
    return _largest_divisor_leq(B, cap)


def _physical_vmem_bytes():
    # Chip-aware VMEM ceiling (v5e/v6e: 128 MiB, v7x: 64 MiB per TensorCore).
    # Falls back to the most conservative (v7x) figure if the query is unavailable.
    try:
        return int(pltpu.get_tpu_info().vmem_capacity_bytes)
    except Exception:
        return 64 << 20


def _vmem_limit_bytes(rows):
    # ~6-8 KB/row of live f32/bf16 temporaries + double-buffered in/out row blocks
    # + ~1.6 MB of weight buffers; add slack, then cap at half the physical VMEM.
    need = rows * 12 * 1024 + (8 << 20)
    cap = _physical_vmem_bytes() // 2
    return int(min(max(need, 24 << 20), cap))


def run_encoder(x, attn_bias, params, batch_block=None,
                min_grid_steps=2, max_rows_per_step=2048):
    B, S, D = x.shape
    assert D == INNER_DIM
    if batch_block is None:
        batch_block = pick_batch_block(B, S, min_grid_steps, max_rows_per_step)
    assert B % batch_block == 0
    if batch_block > 1:
        # (R,64)<->(BB,S,64) reshapes must not cross (8,128) tiles -> pad S to 8.
        assert S % 8 == 0, "pad sequences to a multiple of 8 before blocking the batch"
    rows = batch_block * S
    assert rows % 8 == 0 or rows == B * S, "row block must be sublane aligned"

    # Fused (q|k|v, scale folded into wq) weight was built at parameter-load time.
    wqkv = params["wqkv"]

    # Flatten batch*seq rows in the wrapper so the kernel sees a 2-D row block.
    x2d = x.reshape(B * S, D)

    def full_spec(shape):
        n = len(shape)
        return pl.BlockSpec(shape, lambda b, _n=n: (0,) * _n)

    in_specs = [
        pl.BlockSpec(memory_space=pltpu.MemorySpace.SMEM),        # ScaleNorm gains
        pl.BlockSpec((rows, D), lambda b: (b, 0)),                # x rows
        pl.BlockSpec((batch_block, 1, S), lambda b: (b, 0, 0)),   # additive key-padding bias
        full_spec((DEPTH, D, 3 * D)),     # fused wqkv (bf16)
        full_spec((DEPTH, D, D)),         # wo   (bf16)
        full_spec((DEPTH, 1, D)),         # bo   (f32)
        full_spec((DEPTH, D, FF_DIM)),    # w1   (bf16)
        full_spec((DEPTH, 1, FF_DIM)),    # b1   (f32)
        full_spec((DEPTH, FF_DIM, D)),    # w2   (bf16)
        full_spec((DEPTH, 1, D)),         # b2   (f32)
    ]
    out_spec = pl.BlockSpec((rows, D), lambda b: (b, 0))

    out = pl.pallas_call(
        encoder_kernel,
        out_shape=jax.ShapeDtypeStruct((B * S, D), jnp.float32),
        grid_spec=pltpu.PrefetchScalarGridSpec(
            num_scalar_prefetch=0, grid=(B // batch_block,),
            in_specs=in_specs, out_specs=out_spec),
        compiler_params=pltpu.CompilerParams(
            dimension_semantics=("parallel",),
            vmem_limit_bytes=_vmem_limit_bytes(rows)),
    )(params["g"], x2d, attn_bias,
      wqkv, params["wo"], params["bo"],
      params["w1"], params["b1"], params["w2"], params["b2"])
    return out.reshape(B, S, D)


# ------------------------------ plain-JAX glue -------------------------------
def timestep_embedding(timesteps, dim, max_period=10000):
    half = dim // 2
    freqs = jnp.exp(-math.log(max_period) *
                    jnp.arange(half, dtype=jnp.float32) / half)
    args = timesteps.astype(jnp.float32)[:, None] * freqs[None, :]
    return jnp.concatenate([jnp.cos(args), jnp.sin(args)], axis=-1)


def embed_inputs(params, tokens, timesteps):
    B, S = tokens.shape
    x = params["token_emb"][tokens]                               # token_emb(tokens)
    x = x + (params["pos_emb"][:S] * EMB_SCALE)[None, :, :]       # AbsolutePositionalEmbedding
    # LineEmbedding: cumsum of '\n' occurrences, clamped to max_lines-1
    n = jnp.minimum(
        jnp.cumsum((tokens == LINE_SEP_ID).astype(jnp.int32), axis=1),
        MAX_LINES - 1)
    x = x + params["line_emb"][n] * EMB_SCALE
    if timesteps is not None:
        te = timestep_embedding(timesteps, INNER_DIM)
        emb = EMB_SCALE * (jnp.dot(jax.nn.silu(te), params["time_w"]) + params["time_b"])
        x = x + emb[:, None, :]
    attn_mask = tokens != 0                                            # (B, S)
    mask_f = attn_mask.astype(jnp.float32)[:, None, :]                 # (B, 1, S)
    attn_bias = jnp.where(attn_mask, 0.0, NEG_INF).astype(jnp.float32)[:, None, :]
    return x.astype(jnp.float32), mask_f, attn_bias, attn_mask


def text_encoder_forward(params, tokens, timesteps=None, batch_block=None):
    x, _, attn_bias, attn_mask = embed_inputs(params, tokens, timesteps)
    out = run_encoder(x, attn_bias, params, batch_block=batch_block)
    return out, attn_mask


# ------------------------------ reference (JAX) ------------------------------
def _scalenorm_ref(h, g):
    norm = jnp.sqrt(jnp.sum(h * h, axis=-1, keepdims=True)) * (INNER_DIM ** -0.5)
    return h / jnp.maximum(norm, SCALENORM_EPS) * g


def encoder_reference(params, x, mask_f):
    # f32 math (HIGHEST precision), unfused weights, explicit scale + where mask.
    hp = jax.lax.Precision.HIGHEST
    f32 = lambda w: w.astype(jnp.float32)
    B, S, D = x.shape
    for l in range(DEPTH):
        h = _scalenorm_ref(x, params["g"][2 * l])
        q = jnp.einsum("bsd,de->bse", h, f32(params["wq"][l]), precision=hp)
        k = jnp.einsum("bsd,de->bse", h, f32(params["wk"][l]), precision=hp)
        v = jnp.einsum("bsd,de->bse", h, f32(params["wv"][l]), precision=hp)
        q = q.reshape(B, S, N_HEADS, HEAD_DIM)
        k = k.reshape(B, S, N_HEADS, HEAD_DIM)
        v = v.reshape(B, S, N_HEADS, HEAD_DIM)
        dots = jnp.einsum("bihd,bjhd->bhij", q, k, precision=hp) * ATTN_SCALE
        dots = jnp.where(mask_f[:, :, None, :] > 0.5, dots, NEG_INF)
        p = jax.nn.softmax(dots, axis=-1)
        o = jnp.einsum("bhij,bjhd->bihd", p, v, precision=hp).reshape(B, S, D)
        x = x + jnp.einsum("bsd,de->bse", o, f32(params["wo"][l]), precision=hp) + params["bo"][l]
        h = _scalenorm_ref(x, params["g"][2 * l + 1])
        h1 = jax.nn.gelu(
            jnp.einsum("bsd,df->bsf", h, f32(params["w1"][l]), precision=hp) + params["b1"][l],
            approximate=True)
        x = x + jnp.einsum("bsf,fd->bsd", h1, f32(params["w2"][l]), precision=hp) + params["b2"][l]
    return _scalenorm_ref(x, params["g"][2 * DEPTH])


# ------------------------------- parameters ----------------------------------
def fuse_qkv_weights(wq, wk, wv):
    # Parameter-load-time transform (done once, not per forward call): fuse q/k/v
    # into one (DEPTH, D, 3D) weight and fold the attention scale into wq
    # (ATTN_SCALE = 2**-3 is a power of two -> the bf16 fold is exact).
    return jnp.concatenate([wq * ATTN_SCALE, wk, wv], axis=-1)


def init_params(key):
    D, F = INNER_DIM, FF_DIM
    ks = jax.random.split(key, 10)

    def nrm(k, shape, std, dtype=jnp.float32):
        return (jax.random.normal(k, shape, jnp.float32) * std).astype(dtype)

    bf = jnp.bfloat16
    wq = nrm(ks[4], (DEPTH, D, D), D ** -0.5, bf)
    wk = nrm(ks[5], (DEPTH, D, D), D ** -0.5, bf)
    wv = nrm(ks[6], (DEPTH, D, D), D ** -0.5, bf)
    return dict(
        token_emb=nrm(ks[0], (NUM_TOKENS, D), math.sqrt(2.0 / D)),   # kaiming_normal-style
        pos_emb=nrm(ks[1], (MAX_SEQ_LEN, D), 1.0),
        line_emb=nrm(ks[2], (MAX_LINES, D), 1.0),
        time_w=nrm(ks[3], (D, D), D ** -0.5),
        time_b=jnp.zeros((D,), jnp.float32),
        g=jnp.ones((2 * DEPTH + 1,), jnp.float32),                   # ScaleNorm gains
        # Encoder matmul weights are stored in bf16 (halves VMEM/DMA footprint;
        # matmuls accumulate in f32). Biases/gains stay f32.
        wq=wq, wk=wk, wv=wv,
        wqkv=fuse_qkv_weights(wq, wk, wv),                           # load-time fuse
        wo=nrm(ks[7], (DEPTH, D, D), D ** -0.5, bf),
        bo=jnp.zeros((DEPTH, 1, D), jnp.float32),
        w1=nrm(ks[8], (DEPTH, D, F), D ** -0.5, bf),
        b1=jnp.zeros((DEPTH, 1, F), jnp.float32),
        w2=nrm(ks[9], (DEPTH, F, D), F ** -0.5, bf),
        b2=jnp.zeros((DEPTH, 1, D), jnp.float32),
    )


# ---------------------------------- main --------------------------------------
if __name__ == "__main__":
    key = jax.random.PRNGKey(0)
    pkey, tkey = jax.random.split(key)
    params = init_params(pkey)

    B, S = 2, 16
    tokens = jax.random.randint(tkey, (B, S), 1, NUM_TOKENS)
    tokens = tokens.at[:, 4].set(LINE_SEP_ID)      # '\n' separators -> line embedding
    tokens = tokens.at[0, 9].set(LINE_SEP_ID)
    tokens = tokens.at[0, 13:].set(0)              # padding -> attention mask
    tokens = tokens.at[1, 15:].set(0)
    timesteps = jnp.array([10.0, 500.0], dtype=jnp.float32)

    out, attn_mask = text_encoder_forward(params, tokens, timesteps)
    out = jax.block_until_ready(out)

    # sanity check against a pure-JAX f32 reference of the same math (same stored
    # bf16 weights, f32 activations / HIGHEST precision). Kernel uses bf16 matmul
    # operands with f32 accumulation, hence the slightly looser tolerance.
    x0, mask_f, _, _ = embed_inputs(params, tokens, timesteps)
    ref = encoder_reference(params, x0, mask_f)
    err = float(jnp.max(jnp.abs(out - ref)))
    assert out.shape == (B, S, INNER_DIM)
    assert bool(jnp.all(jnp.isfinite(out)))
    assert err < 5e-2, err

    print("KERNEL_OK")
</pallas_src>

<mosaic_0001>
module attributes {stable_mosaic.version = 11 : i64} {
  func.func @encoder_kernel(%arg0: i32, %arg1: memref<5xf32, #tpu.memory_space<smem>>, %arg2: memref<16x128xf32, #tpu.memory_space<vmem>>, %arg3: memref<1x1x16xf32, #tpu.memory_space<vmem>>, %arg4: memref<2x128x384xbf16, #tpu.memory_space<vmem>>, %arg5: memref<2x128x128xbf16, #tpu.memory_space<vmem>>, %arg6: memref<2x1x128xf32, #tpu.memory_space<vmem>>, %arg7: memref<2x128x512xbf16, #tpu.memory_space<vmem>>, %arg8: memref<2x1x512xf32, #tpu.memory_space<vmem>>, %arg9: memref<2x512x128xbf16, #tpu.memory_space<vmem>>, %arg10: memref<2x1x128xf32, #tpu.memory_space<vmem>>, %arg11: memref<16x128xf32, #tpu.memory_space<vmem>>) attributes {dimension_semantics = [#tpu.dimension_semantics<parallel>], iteration_bounds = array<i64: 2>, scalar_prefetch = 0 : i64, scratch_operands = 0 : i64, tpu.core_type = #tpu.core_type<tc>, window_params = [{transform_indices = @transform_0, window_bounds = array<i64: 5>}, {transform_indices = @transform_1, window_bounds = array<i64: 16, 128>}, {transform_indices = @transform_2, window_bounds = array<i64: 1, 1, 16>}, {pipeline_mode = #tpu.pipeline_mode<synchronous>, transform_indices = @transform_3, window_bounds = array<i64: 2, 128, 384>}, {pipeline_mode = #tpu.pipeline_mode<synchronous>, transform_indices = @transform_4, window_bounds = array<i64: 2, 128, 128>}, {pipeline_mode = #tpu.pipeline_mode<synchronous>, transform_indices = @transform_5, window_bounds = array<i64: 2, 1, 128>}, {pipeline_mode = #tpu.pipeline_mode<synchronous>, transform_indices = @transform_6, window_bounds = array<i64: 2, 128, 512>}, {pipeline_mode = #tpu.pipeline_mode<synchronous>, transform_indices = @transform_7, window_bounds = array<i64: 2, 1, 512>}, {pipeline_mode = #tpu.pipeline_mode<synchronous>, transform_indices = @transform_8, window_bounds = array<i64: 2, 512, 128>}, {pipeline_mode = #tpu.pipeline_mode<synchronous>, transform_indices = @transform_9, window_bounds = array<i64: 2, 1, 128>}, {transform_indices = @transform_10, window_bounds = array<i64: 16, 128>}]} {
    %c0 = arith.constant 0 : index
    %c0_0 = arith.constant 0 : index
    %0 = vector.load %arg2[%c0, %c0_0] : memref<16x128xf32, #tpu.memory_space<vmem>>, vector<16x128xf32>
    %c0_1 = arith.constant 0 : index
    %c0_2 = arith.constant 0 : index
    %c0_3 = arith.constant 0 : index
    %1 = vector.load %arg3[%c0_1, %c0_2, %c0_3] : memref<1x1x16xf32, #tpu.memory_space<vmem>>, vector<1x1x16xf32>
    %2 = vector.shape_cast %1 : vector<1x1x16xf32> to vector<1x1x16xf32>
    %3 = vector.broadcast %2 : vector<1x1x16xf32> to vector<1x16x16xf32>
    %c0_4 = arith.constant 0 : index
    %4 = memref.load %arg1[%c0_4] : memref<5xf32, #tpu.memory_space<smem>>
    %5 = arith.mulf %0, %0 : vector<16x128xf32>
    %cst = arith.constant dense<0.000000e+00> : vector<16xf32>
    %6 = vector.multi_reduction <add>, %5, %cst [1] : vector<16x128xf32> to vector<16xf32>
    %7 = vector.shape_cast %6 : vector<16xf32> to vector<16x1xf32>
    %cst_5 = arith.constant 7.812500e-03 : f32
    %8 = vector.broadcast %cst_5 : f32 to vector<16x1xf32>
    %9 = arith.mulf %7, %8 : vector<16x1xf32>
    %cst_6 = arith.constant 1.000000e-10 : f32
    %10 = vector.broadcast %cst_6 : f32 to vector<16x1xf32>
    %11 = arith.maximumf %9, %10 : vector<16x1xf32>
    %12 = math.rsqrt %11 : vector<16x1xf32>
    %13 = vector.broadcast %4 : f32 to vector<16x1xf32>
    %14 = arith.mulf %12, %13 : vector<16x1xf32>
    %15 = vector.broadcast %14 : vector<16x1xf32> to vector<16x128xf32>
    %16 = arith.mulf %0, %15 : vector<16x128xf32>
    %17 = arith.truncf %16 : vector<16x128xf32> to vector<16x128xbf16>
    %c0_7 = arith.constant 0 : index
    %c0_8 = arith.constant 0 : index
    %c0_9 = arith.constant 0 : index
    %18 = vector.load %arg4[%c0_7, %c0_8, %c0_9] : memref<2x128x384xbf16, #tpu.memory_space<vmem>>, vector<1x128x384xbf16>
    %19 = vector.shape_cast %18 : vector<1x128x384xbf16> to vector<128x384xbf16>
    %cst_10 = arith.constant dense<0.000000e+00> : vector<16x384xf32>
    %20 = tpu.matmul %17, %19, %cst_10 {dimension_numbers = #tpu.dot_dimension_numbers<[1], [0], [0], [1], [0, 0, 1, 1], [], []>} : vector<16x128xbf16>, vector<128x384xbf16>, vector<16x384xf32> -> vector<16x384xf32>
    %21 = vector.shape_cast %20 : vector<16x384xf32> to vector<1x16x384xf32>
    %22 = arith.truncf %21 : vector<1x16x384xf32> to vector<1x16x384xbf16>
    %23 = vector.extract_strided_slice %22 {offsets = [0, 0, 0], sizes = [1, 16, 64], strides = [1, 1, 1]} : vector<1x16x384xbf16> to vector<1x16x64xbf16>
    %24 = vector.extract_strided_slice %22 {offsets = [0, 0, 128], sizes = [1, 16, 64], strides = [1, 1, 1]} : vector<1x16x384xbf16> to vector<1x16x64xbf16>
    %25 = vector.extract_strided_slice %22 {offsets = [0, 0, 256], sizes = [1, 16, 64], strides = [1, 1, 1]} : vector<1x16x384xbf16> to vector<1x16x64xbf16>
    %cst_11 = arith.constant dense<0.000000e+00> : vector<1x16x16xf32>
    %26 = tpu.matmul %23, %24, %cst_11 {dimension_numbers = #tpu.dot_dimension_numbers<[2], [2], [1], [1], [0, 0, 0, 1, 1, 1], [0], [0]>} : vector<1x16x64xbf16>, vector<1x16x64xbf16>, vector<1x16x16xf32> -> vector<1x16x16xf32>
    %27 = arith.addf %26, %3 : vector<1x16x16xf32>
    %cst_12 = arith.constant dense<0xFF800000> : vector<1x16xf32>
    %28 = vector.multi_reduction <maximumf>, %27, %cst_12 [2] : vector<1x16x16xf32> to vector<1x16xf32>
    %29 = vector.shape_cast %28 : vector<1x16xf32> to vector<1x16x1xf32>
    %30 = vector.broadcast %29 : vector<1x16x1xf32> to vector<1x16x16xf32>
    %31 = arith.subf %27, %30 : vector<1x16x16xf32>
    %32 = math.exp %31 : vector<1x16x16xf32>
    %cst_13 = arith.constant dense<0.000000e+00> : vector<1x16xf32>
    %33 = vector.multi_reduction <add>, %32, %cst_13 [2] : vector<1x16x16xf32> to vector<1x16xf32>
    %34 = vector.shape_cast %33 : vector<1x16xf32> to vector<1x16x1xf32>
    %35 = tpu.reciprocal %34 {approx = true} : vector<1x16x1xf32> -> vector<1x16x1xf32>
    %36 = vector.broadcast %35 : vector<1x16x1xf32> to vector<1x16x16xf32>
    %37 = arith.mulf %32, %36 : vector<1x16x16xf32>
    %38 = arith.truncf %37 : vector<1x16x16xf32> to vector<1x16x16xbf16>
    %cst_14 = arith.constant dense<0.000000e+00> : vector<1x16x64xf32>
    %39 = tpu.matmul %38, %25, %cst_14 {dimension_numbers = #tpu.dot_dimension_numbers<[2], [1], [1], [2], [0, 0, 0, 1, 1, 2], [0], [0]>} : vector<1x16x16xbf16>, vector<1x16x64xbf16>, vector<1x16x64xf32> -> vector<1x16x64xf32>
    %40 = vector.shape_cast %39 : vector<1x16x64xf32> to vector<16x64xf32>
    %41 = vector.extract_strided_slice %22 {offsets = [0, 0, 64], sizes = [1, 16, 64], strides = [1, 1, 1]} : vector<1x16x384xbf16> to vector<1x16x64xbf16>
    %42 = vector.extract_strided_slice %22 {offsets = [0, 0, 192], sizes = [1, 16, 64], strides = [1, 1, 1]} : vector<1x16x384xbf16> to vector<1x16x64xbf16>
    %43 = vector.extract_strided_slice %22 {offsets = [0, 0, 320], sizes = [1, 16, 64], strides = [1, 1, 1]} : vector<1x16x384xbf16> to vector<1x16x64xbf16>
    %cst_15 = arith.constant dense<0.000000e+00> : vector<1x16x16xf32>
    %44 = tpu.matmul %41, %42, %cst_15 {dimension_numbers = #tpu.dot_dimension_numbers<[2], [2], [1], [1], [0, 0, 0, 1, 1, 1], [0], [0]>} : vector<1x16x64xbf16>, vector<1x16x64xbf16>, vector<1x16x16xf32> -> vector<1x16x16xf32>
    %45 = arith.addf %44, %3 : vector<1x16x16xf32>
    %cst_16 = arith.constant dense<0xFF800000> : vector<1x16xf32>
    %46 = vector.multi_reduction <maximumf>, %45, %cst_16 [2] : vector<1x16x16xf32> to vector<1x16xf32>
    %47 = vector.shape_cast %46 : vector<1x16xf32> to vector<1x16x1xf32>
    %48 = vector.broadcast %47 : vector<1x16x1xf32> to vector<1x16x16xf32>
    %49 = arith.subf %45, %48 : vector<1x16x16xf32>
    %50 = math.exp %49 : vector<1x16x16xf32>
    %cst_17 = arith.constant dense<0.000000e+00> : vector<1x16xf32>
    %51 = vector.multi_reduction <add>, %50, %cst_17 [2] : vector<1x16x16xf32> to vector<1x16xf32>
    %52 = vector.shape_cast %51 : vector<1x16xf32> to vector<1x16x1xf32>
    %53 = tpu.reciprocal %52 {approx = true} : vector<1x16x1xf32> -> vector<1x16x1xf32>
    %54 = vector.broadcast %53 : vector<1x16x1xf32> to vector<1x16x16xf32>
    %55 = arith.mulf %50, %54 : vector<1x16x16xf32>
    %56 = arith.truncf %55 : vector<1x16x16xf32> to vector<1x16x16xbf16>
    %cst_18 = arith.constant dense<0.000000e+00> : vector<1x16x64xf32>
    %57 = tpu.matmul %56, %43, %cst_18 {dimension_numbers = #tpu.dot_dimension_numbers<[2], [1], [1], [2], [0, 0, 0, 1, 1, 2], [0], [0]>} : vector<1x16x16xbf16>, vector<1x16x64xbf16>, vector<1x16x64xf32> -> vector<1x16x64xf32>
    %58 = vector.shape_cast %57 : vector<1x16x64xf32> to vector<16x64xf32>
    %59 = tpu.concatenate %40, %58 in 1 : vector<16x64xf32>, vector<16x64xf32> -> vector<16x128xf32>
    %60 = arith.truncf %59 : vector<16x128xf32> to vector<16x128xbf16>
    %c0_19 = arith.constant 0 : index
    %c0_20 = arith.constant 0 : index
    %c0_21 = arith.constant 0 : index
    %61 = vector.load %arg5[%c0_19, %c0_20, %c0_21] : memref<2x128x128xbf16, #tpu.memory_space<vmem>>, vector<1x128x128xbf16>
    %62 = vector.shape_cast %61 : vector<1x128x128xbf16> to vector<128x128xbf16>
    %cst_22 = arith.constant dense<0.000000e+00> : vector<16x128xf32>
    %63 = tpu.matmul %60, %62, %cst_22 {dimension_numbers = #tpu.dot_dimension_numbers<[1], [0], [0], [1], [0, 0, 1, 1], [], []>} : vector<16x128xbf16>, vector<128x128xbf16>, vector<16x128xf32> -> vector<16x128xf32>
    %64 = arith.addf %0, %63 : vector<16x128xf32>
    %c0_23 = arith.constant 0 : index
    %c0_24 = arith.constant 0 : index
    %c0_25 = arith.constant 0 : index
    %65 = vector.load %arg6[%c0_23, %c0_24, %c0_25] : memref<2x1x128xf32, #tpu.memory_space<vmem>>, vector<1x1x128xf32>
    %66 = vector.shape_cast %65 : vector<1x1x128xf32> to vector<1x128xf32>
    %67 = vector.broadcast %66 : vector<1x128xf32> to vector<16x128xf32>
    %68 = arith.addf %64, %67 : vector<16x128xf32>
    %c1 = arith.constant 1 : index
    %69 = memref.load %arg1[%c1] : memref<5xf32, #tpu.memory_space<smem>>
    %70 = arith.mulf %68, %68 : vector<16x128xf32>
    %cst_26 = arith.constant dense<0.000000e+00> : vector<16xf32>
    %71 = vector.multi_reduction <add>, %70, %cst_26 [1] : vector<16x128xf32> to vector<16xf32>
    %72 = vector.shape_cast %71 : vector<16xf32> to vector<16x1xf32>
    %cst_27 = arith.constant 7.812500e-03 : f32
    %73 = vector.broadcast %cst_27 : f32 to vector<16x1xf32>
    %74 = arith.mulf %72, %73 : vector<16x1xf32>
    %cst_28 = arith.constant 1.000000e-10 : f32
    %75 = vector.broadcast %cst_28 : f32 to vector<16x1xf32>
    %76 = arith.maximumf %74, %75 : vector<16x1xf32>
    %77 = math.rsqrt %76 : vector<16x1xf32>
    %78 = vector.broadcast %69 : f32 to vector<16x1xf32>
    %79 = arith.mulf %77, %78 : vector<16x1xf32>
    %80 = vector.broadcast %79 : vector<16x1xf32> to vector<16x128xf32>
    %81 = arith.mulf %68, %80 : vector<16x128xf32>
    %82 = arith.truncf %81 : vector<16x128xf32> to vector<16x128xbf16>
    %c0_29 = arith.constant 0 : index
    %c0_30 = arith.constant 0 : index
    %c0_31 = arith.constant 0 : index
    %83 = vector.load %arg7[%c0_29, %c0_30, %c0_31] : memref<2x128x512xbf16, #tpu.memory_space<vmem>>, vector<1x128x512xbf16>
    %84 = vector.shape_cast %83 : vector<1x128x512xbf16> to vector<128x512xbf16>
    %cst_32 = arith.constant dense<0.000000e+00> : vector<16x512xf32>
    %85 = tpu.matmul %82, %84, %cst_32 {dimension_numbers = #tpu.dot_dimension_numbers<[1], [0], [0], [1], [0, 0, 1, 1], [], []>} : vector<16x128xbf16>, vector<128x512xbf16>, vector<16x512xf32> -> vector<16x512xf32>
    %c0_33 = arith.constant 0 : index
    %c0_34 = arith.constant 0 : index
    %c0_35 = arith.constant 0 : index
    %86 = vector.load %arg8[%c0_33, %c0_34, %c0_35] : memref<2x1x512xf32, #tpu.memory_space<vmem>>, vector<1x1x512xf32>
    %87 = vector.shape_cast %86 : vector<1x1x512xf32> to vector<1x512xf32>
    %88 = vector.broadcast %87 : vector<1x512xf32> to vector<16x512xf32>
    %89 = arith.addf %85, %88 : vector<16x512xf32>
    %90 = arith.mulf %89, %89 : vector<16x512xf32>
    %91 = arith.mulf %89, %90 : vector<16x512xf32>
    %cst_36 = arith.constant 4.471500e-02 : f32
    %92 = vector.broadcast %cst_36 : f32 to vector<16x512xf32>
    %93 = arith.mulf %92, %91 : vector<16x512xf32>
    %94 = arith.addf %89, %93 : vector<16x512xf32>
    %cst_37 = arith.constant 0.797884583 : f32
    %95 = vector.broadcast %cst_37 : f32 to vector<16x512xf32>
    %96 = arith.mulf %95, %94 : vector<16x512xf32>
    %97 = math.tanh %96 : vector<16x512xf32>
    %cst_38 = arith.constant 1.000000e+00 : f32
    %98 = vector.broadcast %cst_38 : f32 to vector<16x512xf32>
    %99 = arith.addf %98, %97 : vector<16x512xf32>
    %cst_39 = arith.constant 5.000000e-01 : f32
    %100 = vector.broadcast %cst_39 : f32 to vector<16x512xf32>
    %101 = arith.mulf %100, %99 : vector<16x512xf32>
    %102 = arith.mulf %89, %101 : vector<16x512xf32>
    %103 = arith.truncf %102 : vector<16x512xf32> to vector<16x512xbf16>
    %c0_40 = arith.constant 0 : index
    %c0_41 = arith.constant 0 : index
    %c0_42 = arith.constant 0 : index
    %104 = vector.load %arg9[%c0_40, %c0_41, %c0_42] : memref<2x512x128xbf16, #tpu.memory_space<vmem>>, vector<1x512x128xbf16>
    %105 = vector.shape_cast %104 : vector<1x512x128xbf16> to vector<512x128xbf16>
    %cst_43 = arith.constant dense<0.000000e+00> : vector<16x128xf32>
    %106 = tpu.matmul %103, %105, %cst_43 {dimension_numbers = #tpu.dot_dimension_numbers<[1], [0], [0], [1], [0, 0, 1, 1], [], []>} : vector<16x512xbf16>, vector<512x128xbf16>, vector<16x128xf32> -> vector<16x128xf32>
    %107 = arith.addf %68, %106 : vector<16x128xf32>
    %c0_44 = arith.constant 0 : index
    %c0_45 = arith.constant 0 : index
    %c0_46 = arith.constant 0 : index
    %108 = vector.load %arg10[%c0_44, %c0_45, %c0_46] : memref<2x1x128xf32, #tpu.memory_space<vmem>>, vector<1x1x128xf32>
    %109 = vector.shape_cast %108 : vector<1x1x128xf32> to vector<1x128xf32>
    %110 = vector.broadcast %109 : vector<1x128xf32> to vector<16x128xf32>
    %111 = arith.addf %107, %110 : vector<16x128xf32>
    %c2 = arith.constant 2 : index
    %112 = memref.load %arg1[%c2] : memref<5xf32, #tpu.memory_space<smem>>
    %113 = arith.mulf %111, %111 : vector<16x128xf32>
    %cst_47 = arith.constant dense<0.000000e+00> : vector<16xf32>
    %114 = vector.multi_reduction <add>, %113, %cst_47 [1] : vector<16x128xf32> to vector<16xf32>
    %115 = vector.shape_cast %114 : vector<16xf32> to vector<16x1xf32>
    %cst_48 = arith.constant 7.812500e-03 : f32
    %116 = vector.broadcast %cst_48 : f32 to vector<16x1xf32>
    %117 = arith.mulf %115, %116 : vector<16x1xf32>
    %cst_49 = arith.constant 1.000000e-10 : f32
    %118 = vector.broadcast %cst_49 : f32 to vector<16x1xf32>
    %119 = arith.maximumf %117, %118 : vector<16x1xf32>
    %120 = math.rsqrt %119 : vector<16x1xf32>
    %121 = vector.broadcast %112 : f32 to vector<16x1xf32>
    %122 = arith.mulf %120, %121 : vector<16x1xf32>
    %123 = vector.broadcast %122 : vector<16x1xf32> to vector<16x128xf32>
    %124 = arith.mulf %111, %123 : vector<16x128xf32>
    %125 = arith.truncf %124 : vector<16x128xf32> to vector<16x128xbf16>
    %c1_50 = arith.constant 1 : index
    %c0_51 = arith.constant 0 : index
    %c0_52 = arith.constant 0 : index
    %126 = vector.load %arg4[%c1_50, %c0_51, %c0_52] : memref<2x128x384xbf16, #tpu.memory_space<vmem>>, vector<1x128x384xbf16>
    %127 = vector.shape_cast %126 : vector<1x128x384xbf16> to vector<128x384xbf16>
    %cst_53 = arith.constant dense<0.000000e+00> : vector<16x384xf32>
    %128 = tpu.matmul %125, %127, %cst_53 {dimension_numbers = #tpu.dot_dimension_numbers<[1], [0], [0], [1], [0, 0, 1, 1], [], []>} : vector<16x128xbf16>, vector<128x384xbf16>, vector<16x384xf32> -> vector<16x384xf32>
    %129 = vector.shape_cast %128 : vector<16x384xf32> to vector<1x16x384xf32>
    %130 = arith.truncf %129 : vector<1x16x384xf32> to vector<1x16x384xbf16>
    %131 = vector.extract_strided_slice %130 {offsets = [0, 0, 0], sizes = [1, 16, 64], strides = [1, 1, 1]} : vector<1x16x384xbf16> to vector<1x16x64xbf16>
    %132 = vector.extract_strided_slice %130 {offsets = [0, 0, 128], sizes = [1, 16, 64], strides = [1, 1, 1]} : vector<1x16x384xbf16> to vector<1x16x64xbf16>
    %133 = vector.extract_strided_slice %130 {offsets = [0, 0, 256], sizes = [1, 16, 64], strides = [1, 1, 1]} : vector<1x16x384xbf16> to vector<1x16x64xbf16>
    %cst_54 = arith.constant dense<0.000000e+00> : vector<1x16x16xf32>
    %134 = tpu.matmul %131, %132, %cst_54 {dimension_numbers = #tpu.dot_dimension_numbers<[2], [2], [1], [1], [0, 0, 0, 1, 1, 1], [0], [0]>} : vector<1x16x64xbf16>, vector<1x16x64xbf16>, vector<1x16x16xf32> -> vector<1x16x16xf32>
    %135 = arith.addf %134, %3 : vector<1x16x16xf32>
    %cst_55 = arith.constant dense<0xFF800000> : vector<1x16xf32>
    %136 = vector.multi_reduction <maximumf>, %135, %cst_55 [2] : vector<1x16x16xf32> to vector<1x16xf32>
    %137 = vector.shape_cast %136 : vector<1x16xf32> to vector<1x16x1xf32>
    %138 = vector.broadcast %137 : vector<1x16x1xf32> to vector<1x16x16xf32>
    %139 = arith.subf %135, %138 : vector<1x16x16xf32>
    %140 = math.exp %139 : vector<1x16x16xf32>
    %cst_56 = arith.constant dense<0.000000e+00> : vector<1x16xf32>
    %141 = vector.multi_reduction <add>, %140, %cst_56 [2] : vector<1x16x16xf32> to vector<1x16xf32>
    %142 = vector.shape_cast %141 : vector<1x16xf32> to vector<1x16x1xf32>
    %143 = tpu.reciprocal %142 {approx = true} : vector<1x16x1xf32> -> vector<1x16x1xf32>
    %144 = vector.broadcast %143 : vector<1x16x1xf32> to vector<1x16x16xf32>
    %145 = arith.mulf %140, %144 : vector<1x16x16xf32>
    %146 = arith.truncf %145 : vector<1x16x16xf32> to vector<1x16x16xbf16>
    %cst_57 = arith.constant dense<0.000000e+00> : vector<1x16x64xf32>
    %147 = tpu.matmul %146, %133, %cst_57 {dimension_numbers = #tpu.dot_dimension_numbers<[2], [1], [1], [2], [0, 0, 0, 1, 1, 2], [0], [0]>} : vector<1x16x16xbf16>, vector<1x16x64xbf16>, vector<1x16x64xf32> -> vector<1x16x64xf32>
    %148 = vector.shape_cast %147 : vector<1x16x64xf32> to vector<16x64xf32>
    %149 = vector.extract_strided_slice %130 {offsets = [0, 0, 64], sizes = [1, 16, 64], strides = [1, 1, 1]} : vector<1x16x384xbf16> to vector<1x16x64xbf16>
    %150 = vector.extract_strided_slice %130 {offsets = [0, 0, 192], sizes = [1, 16, 64], strides = [1, 1, 1]} : vector<1x16x384xbf16> to vector<1x16x64xbf16>
    %151 = vector.extract_strided_slice %130 {offsets = [0, 0, 320], sizes = [1, 16, 64], strides = [1, 1, 1]} : vector<1x16x384xbf16> to vector<1x16x64xbf16>
    %cst_58 = arith.constant dense<0.000000e+00> : vector<1x16x16xf32>
    %152 = tpu.matmul %149, %150, %cst_58 {dimension_numbers = #tpu.dot_dimension_numbers<[2], [2], [1], [1], [0, 0, 0, 1, 1, 1], [0], [0]>} : vector<1x16x64xbf16>, vector<1x16x64xbf16>, vector<1x16x16xf32> -> vector<1x16x16xf32>
    %153 = arith.addf %152, %3 : vector<1x16x16xf32>
    %cst_59 = arith.constant dense<0xFF800000> : vector<1x16xf32>
    %154 = vector.multi_reduction <maximumf>, %153, %cst_59 [2] : vector<1x16x16xf32> to vector<1x16xf32>
    %155 = vector.shape_cast %154 : vector<1x16xf32> to vector<1x16x1xf32>
    %156 = vector.broadcast %155 : vector<1x16x1xf32> to vector<1x16x16xf32>
    %157 = arith.subf %153, %156 : vector<1x16x16xf32>
    %158 = math.exp %157 : vector<1x16x16xf32>
    %cst_60 = arith.constant dense<0.000000e+00> : vector<1x16xf32>
    %159 = vector.multi_reduction <add>, %158, %cst_60 [2] : vector<1x16x16xf32> to vector<1x16xf32>
    %160 = vector.shape_cast %159 : vector<1x16xf32> to vector<1x16x1xf32>
    %161 = tpu.reciprocal %160 {approx = true} : vector<1x16x1xf32> -> vector<1x16x1xf32>
    %162 = vector.broadcast %161 : vector<1x16x1xf32> to vector<1x16x16xf32>
    %163 = arith.mulf %158, %162 : vector<1x16x16xf32>
    %164 = arith.truncf %163 : vector<1x16x16xf32> to vector<1x16x16xbf16>
    %cst_61 = arith.constant dense<0.000000e+00> : vector<1x16x64xf32>
    %165 = tpu.matmul %164, %151, %cst_61 {dimension_numbers = #tpu.dot_dimension_numbers<[2], [1], [1], [2], [0, 0, 0, 1, 1, 2], [0], [0]>} : vector<1x16x16xbf16>, vector<1x16x64xbf16>, vector<1x16x64xf32> -> vector<1x16x64xf32>
    %166 = vector.shape_cast %165 : vector<1x16x64xf32> to vector<16x64xf32>
    %167 = tpu.concatenate %148, %166 in 1 : vector<16x64xf32>, vector<16x64xf32> -> vector<16x128xf32>
    %168 = arith.truncf %167 : vector<16x128xf32> to vector<16x128xbf16>
    %c1_62 = arith.constant 1 : index
    %c0_63 = arith.constant 0 : index
    %c0_64 = arith.constant 0 : index
    %169 = vector.load %arg5[%c1_62, %c0_63, %c0_64] : memref<2x128x128xbf16, #tpu.memory_space<vmem>>, vector<1x128x128xbf16>
    %170 = vector.shape_cast %169 : vector<1x128x128xbf16> to vector<128x128xbf16>
    %cst_65 = arith.constant dense<0.000000e+00> : vector<16x128xf32>
    %171 = tpu.matmul %168, %170, %cst_65 {dimension_numbers = #tpu.dot_dimension_numbers<[1], [0], [0], [1], [0, 0, 1, 1], [], []>} : vector<16x128xbf16>, vector<128x128xbf16>, vector<16x128xf32> -> vector<16x128xf32>
    %172 = arith.addf %111, %171 : vector<16x128xf32>
    %c1_66 = arith.constant 1 : index
    %c0_67 = arith.constant 0 : index
    %c0_68 = arith.constant 0 : index
    %173 = vector.load %arg6[%c1_66, %c0_67, %c0_68] : memref<2x1x128xf32, #tpu.memory_space<vmem>>, vector<1x1x128xf32>
    %174 = vector.shape_cast %173 : vector<1x1x128xf32> to vector<1x128xf32>
    %175 = vector.broadcast %174 : vector<1x128xf32> to vector<16x128xf32>
    %176 = arith.addf %172, %175 : vector<16x128xf32>
    %c3 = arith.constant 3 : index
    %177 = memref.load %arg1[%c3] : memref<5xf32, #tpu.memory_space<smem>>
    %178 = arith.mulf %176, %176 : vector<16x128xf32>
    %cst_69 = arith.constant dense<0.000000e+00> : vector<16xf32>
    %179 = vector.multi_reduction <add>, %178, %cst_69 [1] : vector<16x128xf32> to vector<16xf32>
    %180 = vector.shape_cast %179 : vector<16xf32> to vector<16x1xf32>
    %cst_70 = arith.constant 7.812500e-03 : f32
    %181 = vector.broadcast %cst_70 : f32 to vector<16x1xf32>
    %182 = arith.mulf %180, %181 : vector<16x1xf32>
    %cst_71 = arith.constant 1.000000e-10 : f32
    %183 = vector.broadcast %cst_71 : f32 to vector<16x1xf32>
    %184 = arith.maximumf %182, %183 : vector<16x1xf32>
    %185 = math.rsqrt %184 : vector<16x1xf32>
    %186 = vector.broadcast %177 : f32 to vector<16x1xf32>
    %187 = arith.mulf %185, %186 : vector<16x1xf32>
    %188 = vector.broadcast %187 : vector<16x1xf32> to vector<16x128xf32>
    %189 = arith.mulf %176, %188 : vector<16x128xf32>
    %190 = arith.truncf %189 : vector<16x128xf32> to vector<16x128xbf16>
    %c1_72 = arith.constant 1 : index
    %c0_73 = arith.constant 0 : index
    %c0_74 = arith.constant 0 : index
    %191 = vector.load %arg7[%c1_72, %c0_73, %c0_74] : memref<2x128x512xbf16, #tpu.memory_space<vmem>>, vector<1x128x512xbf16>
    %192 = vector.shape_cast %191 : vector<1x128x512xbf16> to vector<128x512xbf16>
    %cst_75 = arith.constant dense<0.000000e+00> : vector<16x512xf32>
    %193 = tpu.matmul %190, %192, %cst_75 {dimension_numbers = #tpu.dot_dimension_numbers<[1], [0], [0], [1], [0, 0, 1, 1], [], []>} : vector<16x128xbf16>, vector<128x512xbf16>, vector<16x512xf32> -> vector<16x512xf32>
    %c1_76 = arith.constant 1 : index
    %c0_77 = arith.constant 0 : index
    %c0_78 = arith.constant 0 : index
    %194 = vector.load %arg8[%c1_76, %c0_77, %c0_78] : memref<2x1x512xf32, #tpu.memory_space<vmem>>, vector<1x1x512xf32>
    %195 = vector.shape_cast %194 : vector<1x1x512xf32> to vector<1x512xf32>
    %196 = vector.broadcast %195 : vector<1x512xf32> to vector<16x512xf32>
    %197 = arith.addf %193, %196 : vector<16x512xf32>
    %198 = arith.mulf %197, %197 : vector<16x512xf32>
    %199 = arith.mulf %197, %198 : vector<16x512xf32>
    %cst_79 = arith.constant 4.471500e-02 : f32
    %200 = vector.broadcast %cst_79 : f32 to vector<16x512xf32>
    %201 = arith.mulf %200, %199 : vector<16x512xf32>
    %202 = arith.addf %197, %201 : vector<16x512xf32>
    %cst_80 = arith.constant 0.797884583 : f32
    %203 = vector.broadcast %cst_80 : f32 to vector<16x512xf32>
    %204 = arith.mulf %203, %202 : vector<16x512xf32>
    %205 = math.tanh %204 : vector<16x512xf32>
    %cst_81 = arith.constant 1.000000e+00 : f32
    %206 = vector.broadcast %cst_81 : f32 to vector<16x512xf32>
    %207 = arith.addf %206, %205 : vector<16x512xf32>
    %cst_82 = arith.constant 5.000000e-01 : f32
    %208 = vector.broadcast %cst_82 : f32 to vector<16x512xf32>
    %209 = arith.mulf %208, %207 : vector<16x512xf32>
    %210 = arith.mulf %197, %209 : vector<16x512xf32>
    %211 = arith.truncf %210 : vector<16x512xf32> to vector<16x512xbf16>
    %c1_83 = arith.constant 1 : index
    %c0_84 = arith.constant 0 : index
    %c0_85 = arith.constant 0 : index
    %212 = vector.load %arg9[%c1_83, %c0_84, %c0_85] : memref<2x512x128xbf16, #tpu.memory_space<vmem>>, vector<1x512x128xbf16>
    %213 = vector.shape_cast %212 : vector<1x512x128xbf16> to vector<512x128xbf16>
    %cst_86 = arith.constant dense<0.000000e+00> : vector<16x128xf32>
    %214 = tpu.matmul %211, %213, %cst_86 {dimension_numbers = #tpu.dot_dimension_numbers<[1], [0], [0], [1], [0, 0, 1, 1], [], []>} : vector<16x512xbf16>, vector<512x128xbf16>, vector<16x128xf32> -> vector<16x128xf32>
    %215 = arith.addf %176, %214 : vector<16x128xf32>
    %c1_87 = arith.constant 1 : index
    %c0_88 = arith.constant 0 : index
    %c0_89 = arith.constant 0 : index
    %216 = vector.load %arg10[%c1_87, %c0_88, %c0_89] : memref<2x1x128xf32, #tpu.memory_space<vmem>>, vector<1x1x128xf32>
    %217 = vector.shape_cast %216 : vector<1x1x128xf32> to vector<1x128xf32>
    %218 = vector.broadcast %217 : vector<1x128xf32> to vector<16x128xf32>
    %219 = arith.addf %215, %218 : vector<16x128xf32>
    %c4 = arith.constant 4 : index
    %220 = memref.load %arg1[%c4] : memref<5xf32, #tpu.memory_space<smem>>
    %221 = arith.mulf %219, %219 : vector<16x128xf32>
    %cst_90 = arith.constant dense<0.000000e+00> : vector<16xf32>
    %222 = vector.multi_reduction <add>, %221, %cst_90 [1] : vector<16x128xf32> to vector<16xf32>
    %223 = vector.shape_cast %222 : vector<16xf32> to vector<16x1xf32>
    %cst_91 = arith.constant 7.812500e-03 : f32
    %224 = vector.broadcast %cst_91 : f32 to vector<16x1xf32>
    %225 = arith.mulf %223, %224 : vector<16x1xf32>
    %cst_92 = arith.constant 1.000000e-10 : f32
    %226 = vector.broadcast %cst_92 : f32 to vector<16x1xf32>
    %227 = arith.maximumf %225, %226 : vector<16x1xf32>
    %228 = math.rsqrt %227 : vector<16x1xf32>
    %229 = vector.broadcast %220 : f32 to vector<16x1xf32>
    %230 = arith.mulf %228, %229 : vector<16x1xf32>
    %231 = vector.broadcast %230 : vector<16x1xf32> to vector<16x128xf32>
    %232 = arith.mulf %219, %231 : vector<16x128xf32>
    %c0_93 = arith.constant 0 : index
    %c0_94 = arith.constant 0 : index
    %233 = vector.load %arg11[%c0_93, %c0_94] : memref<16x128xf32, #tpu.memory_space<vmem>>, vector<16x128xf32>
    tpu.vector_store %arg11[%c0_93, %c0_94], %232 {strides = array<i32>} : memref<16x128xf32, #tpu.memory_space<vmem>>, vector<16x128xf32>,
    return
  }
  func.func @transform_0(%arg0: i32) -> i32 {
    %c0_i32 = arith.constant 0 : i32
    %c0_i32_0 = arith.constant 0 : i32
    return %c0_i32 : i32
  }
  func.func @transform_1(%arg0: i32) -> (i32, i32) {
    %c0_i32 = arith.constant 0 : i32
    %c0_i32_0 = arith.constant 0 : i32
    return %arg0, %c0_i32 : i32, i32
  }
  func.func @transform_2(%arg0: i32) -> (i32, i32, i32) {
    %c0_i32 = arith.constant 0 : i32
    %c0_i32_0 = arith.constant 0 : i32
    %c0_i32_1 = arith.constant 0 : i32
    return %arg0, %c0_i32, %c0_i32_0 : i32, i32, i32
  }
  func.func @transform_3(%arg0: i32) -> (i32, i32, i32) {
    %c0_i32 = arith.constant 0 : i32
    %c0_i32_0 = arith.constant 0 : i32
    %c0_i32_1 = arith.constant 0 : i32
    %c0_i32_2 = arith.constant 0 : i32
    return %c0_i32, %c0_i32_0, %c0_i32_1 : i32, i32, i32
  }
  func.func @transform_4(%arg0: i32) -> (i32, i32, i32) {
    %c0_i32 = arith.constant 0 : i32
    %c0_i32_0 = arith.constant 0 : i32
    %c0_i32_1 = arith.constant 0 : i32
    %c0_i32_2 = arith.constant 0 : i32
    return %c0_i32, %c0_i32_0, %c0_i32_1 : i32, i32, i32
  }
  func.func @transform_5(%arg0: i32) -> (i32, i32, i32) {
    %c0_i32 = arith.constant 0 : i32
    %c0_i32_0 = arith.constant 0 : i32
    %c0_i32_1 = arith.constant 0 : i32
    %c0_i32_2 = arith.constant 0 : i32
    return %c0_i32, %c0_i32_0, %c0_i32_1 : i32, i32, i32
  }
  func.func @transform_6(%arg0: i32) -> (i32, i32, i32) {
    %c0_i32 = arith.constant 0 : i32
    %c0_i32_0 = arith.constant 0 : i32
    %c0_i32_1 = arith.constant 0 : i32
    %c0_i32_2 = arith.constant 0 : i32
    return %c0_i32, %c0_i32_0, %c0_i32_1 : i32, i32, i32
  }
  func.func @transform_7(%arg0: i32) -> (i32, i32, i32) {
    %c0_i32 = arith.constant 0 : i32
    %c0_i32_0 = arith.constant 0 : i32
    %c0_i32_1 = arith.constant 0 : i32
    %c0_i32_2 = arith.constant 0 : i32
    return %c0_i32, %c0_i32_0, %c0_i32_1 : i32, i32, i32
  }
  func.func @transform_8(%arg0: i32) -> (i32, i32, i32) {
    %c0_i32 = arith.constant 0 : i32
    %c0_i32_0 = arith.constant 0 : i32
    %c0_i32_1 = arith.constant 0 : i32
    %c0_i32_2 = arith.constant 0 : i32
    return %c0_i32, %c0_i32_0, %c0_i32_1 : i32, i32, i32
  }
  func.func @transform_9(%arg0: i32) -> (i32, i32, i32) {
    %c0_i32 = arith.constant 0 : i32
    %c0_i32_0 = arith.constant 0 : i32
    %c0_i32_1 = arith.constant 0 : i32
    %c0_i32_2 = arith.constant 0 : i32
    return %c0_i32, %c0_i32_0, %c0_i32_1 : i32, i32, i32
  }
  func.func @transform_10(%arg0: i32) -> (i32, i32) {
    %c0_i32 = arith.constant 0 : i32
    %c0_i32_0 = arith.constant 0 : i32
    return %arg0, %c0_i32 : i32, i32
  }
}

</mosaic_0001>

<bundles_post_ra>
// kernel: tpu_custom_call.1
= control target key start
LH: loop header
LB: loop body
LE: loop exit
PB: predicated region body
PF: predicated region fallthrough
CT: control target
= control target key end

     0   :  { %s5212_s0 = inlined_call_operand.hbm [shape: f32[5], index: 0, kind: input, shape index: {}]   ;;  %s5213_s1 = inlined_call_operand.hbm [shape: f32[32,128], index: 1, kind: input, shape index: {}]   ;;  %s5214_s2 = inlined_call_operand.vmem [shape: f32[2,1,16], index: 2, kind: input, shape index: {}]   ;;  %s5215_s3 = inlined_call_operand.hbm [shape: bf16[2,128,384], index: 3, kind: input, shape index: {}]   ;;  %s5216_s4 = inlined_call_operand.hbm [shape: bf16[2,128,128], index: 4, kind: input, shape index: {}]   ;;  %s5217_s5 = inlined_call_operand.vmem [shape: f32[2,1,128], index: 5, kind: input, shape index: {}]   ;;  %s5218_s6 = inlined_call_operand.hbm [shape: bf16[2,128,512], index: 6, kind: input, shape index: {}]   ;;  %s5219_s7 = inlined_call_operand.vmem [shape: f32[2,1,512], index: 7, kind: input, shape index: {}]   ;;  %s5220_s8 = inlined_call_operand.hbm [shape: bf16[2,512,128], index: 8, kind: input, shape index: {}]   ;;  %s5221_s9 = inlined_call_operand.vmem [shape: f32[2,1,128], index: 9, kind: input, shape index: {}]   ;;  %s5222_s10 = inlined_call_operand.hbm [shape: f32[32,128], index: 10, kind: output, shape index: {}]  }
   0x1   :  { %5227 = sst [smem:[#allocation19_spill]] %s5212_s0 }
   0x2   :  { %5228 = sst [smem:[#allocation20_spill]] %s5215_s3 }
   0x3   :  { %5229 = sst [smem:[#allocation21_spill]] %s5216_s4 }
   0x4   :  { %5230 = sst [smem:[#allocation22_spill]] %s5218_s6 }
   0x5   :  { %15 = vsyncpa [#allocation5], 0 }
   0x6   :  { %16 = vsyncpa [#allocation3], 0 }
   0x7   :  { %18 = vsyncpa [#allocation3 + $0x1], 0 }
   0x8   :  { %19 = vsyncpa [#allocation8], 0 }
   0x9   :  { %20 = vsyncpa [#allocation11], 0 }
   0xa   :  { %21 = vsyncpa [#allocation4], 0 }
   0xb   :  { %23 = vsyncpa [#allocation4 + $0x1], 0  ;;  %s4650_s13 = smov 0   ;;  %s4652_s14 = smov 0  }
   0xc   :  { %s4654_s15 = smov 0   ;;  %s4656_s16 = smov 0  }
   0xd LB: > { %s4574_s17 = smov [#allocation7]   ;;  %s4671_s19 = sadd.s32 4294967295, %s4572_s16   ;;  %s4572_s16 = sphi %s4656_s16, %s5255_s16   ;;  %s4568_s15 = sphi %s4654_s15, %s5254_s15   ;;  %s4564_s14 = sphi %s4652_s14, %s5253_s14   ;;  %s4560_s13 = sphi %s4650_s13, %s5252_s13  }
   0xe   : > { %s301_s18 = sshll.u32 %s4574_s17, 4  ;;  %p3400_p0 = scmp.ge.s32.totalorder %s4572_s16, 1  ;;  %s302_s18 = int_to_ptr.vmem [resolvable:$true] %s301_s18 }
   0xf   : > { %p5223_p1 = scmp.eq.s32.totalorder %s4671_s19, 0  ;;  %p280_p2 = scmp.lt.s32.totalorder %s4572_s16, 3 }
  0x10   : > { %s4575_s21 = smov [#allocation10]   ;;  %s4364_s24 = scalar_lea.vmem %s302_s18, 6144 }
  0x11   : > { %p4676_p3 = pnand %p3400_p0, %p280_p2  ;;  %s330_s22 = sshll.u32 %s4575_s21, 4  ;;  %s331_s22 = int_to_ptr.vmem [resolvable:$true] %s330_s22 }
  0x12   : > { %p4365_p8 = scmp.ne.s32.totalorder %s302_s18, %s4364_s24  ;;  %p4372_p11 = scmp.lt.s32.totalorder %s302_s18, %s302_s18 }
  0x13   : > { %s5231_s20 = scalar_select %p4676_p3, 1, 0 }
  0x14   : > { %p3929_p5 = pneg %p4676_p3  ;;  %p4373_p12 = scmp.lt.s32.totalorder %s4364_s24, %s4364_s24 }
  0x16   : > { %p4685_p6 = pnand %p3929_p5, %p5223_p1  ;;  %p4374_p13 = por %p4373_p12, %p4372_p11 }
  0x18   : > { %p4355_p7 = pneg %p4685_p6 }
  0x1a   : > { %p4367_p9 = pnand %p4365_p8, %p4355_p7 }
  0x1c   : > { %p4368_p10 = pneg %p4367_p9 }
  0x1e   : > { %p4375_p0 = pnand %p4374_p13, %p4368_p10 }
  0x20   : > { %4378 = shalt.err (!%p4375_p0)
}
  0x21   : > { %s4576_s25 = smov 192   ;;  %s4577_s26 = smov 12  }
  0x22   : > { %s5233_s3 = sld [smem:[#allocation20_spill]]  ;;  %s4390_s29 = scalar_lea.vmem %s331_s22, 8192 }
  0x23   : > { %p4391_p2 = scmp.ne.s32.totalorder %s331_s22, %s4390_s29  ;;  %p4398_p9 = scmp.lt.s32.totalorder %s331_s22, %s331_s22 }
  0x24   : > { %p4399_p4 = scmp.lt.s32.totalorder %s4390_s29, %s4390_s29 }
  0x25   : > { %p4393_p5 = pnand %p4391_p2, %p4355_p7 }
  0x26   : > { %p4400_p11 = por %p4399_p4, %p4398_p9 }
  0x27   : > { %p4394_p8 = pneg %p4393_p5 }
  0x28   : > { %3935 = dma.hbm_to_vmem [thread:$0]  (!%p4685_p6), %s5233_s3, 6144, %s302_s18, [#allocation8], %s4576_s25, %s4576_s25, %s4577_s26  }
  0x29   : > { %p4401_p10 = pnand %p4400_p11, %p4394_p8 }
  0x2b   : > { %4404 = shalt.err (!%p4401_p10)
}
  0x2c   : > { %s4578_s30 = smov 256   ;;  %s4579_s11 = smov 16  }
  0x2d   : > { %s5234_s6 = sld [smem:[#allocation22_spill]]  ;;  %s4580_s18 = smov [#allocation2]  }
  0x2e   : > { %s5235_s0 = sld [smem:[#allocation19_spill]]  ;;  %s4581_s25 = smov [#allocation9]  }
  0x2f   : > { %s314_s26 = sshll.u32 %s4581_s25, 4  ;;  %s315_s26 = int_to_ptr.vmem [resolvable:$true] %s314_s26 }
  0x30   : > { %s4427_s27 = scalar_lea.vmem %s315_s26, 2048  ;;  %p4435_p0 = scmp.lt.s32.totalorder %s315_s26, %s315_s26 }
  0x31   : > { %p4428_p4 = scmp.ne.s32.totalorder %s315_s26, %s4427_s27  ;;  %p4436_p2 = scmp.lt.s32.totalorder %s4427_s27, %s4427_s27 }
  0x33   : > { %3941 = dma.hbm_to_vmem [thread:$0]  (!%p4685_p6), %s5234_s6, 8192, %s331_s22, [#allocation11], %s4578_s30, %s4578_s30, %s4579_s11  }
  0x34   : > { %3932 = dma.hbm_to_smem (!%p4685_p6), %s5235_s0, 16, %s4580_s18, [#allocation5]  }
  0x35   : > { %p4430_p12 = pnand %p4428_p4, %p4355_p7  ;;  %p4437_p5 = por %p4436_p2, %p4435_p0 }
  0x37   : > { %p4431_p13 = pneg %p4430_p12 }
  0x39   : > { %p4438_p8 = pnand %p4437_p5, %p4431_p13 }
  0x3b   : > { %4441 = shalt.err (!%p4438_p8)
}
  0x3c   : > { %s4582_s22 = smov 64   ;;  %s4583_s28 = smov 4  }
  0x3d   : > { %s5236_s4 = sld [smem:[#allocation21_spill]]  ;;  %s4584_s11 = smov [#allocation12]  }
  0x3e   : > { %s346_s12 = sshll.u32 %s4584_s11, 4  ;;  %s347_s12 = int_to_ptr.vmem [resolvable:$true] %s346_s12 }
  0x3f   : > { %s4453_s17 = scalar_lea.vmem %s347_s12, 8192  ;;  %p4461_p4 = scmp.lt.s32.totalorder %s347_s12, %s347_s12 }
  0x40   : > { %p4454_p9 = scmp.ne.s32.totalorder %s347_s12, %s4453_s17  ;;  %p4462_p12 = scmp.lt.s32.totalorder %s4453_s17, %s4453_s17 }
  0x42   : > { %p4456_p11 = pnand %p4454_p9, %p4355_p7  ;;  %p4463_p13 = por %p4462_p12, %p4461_p4 }
  0x43   : > { %3938 = dma.hbm_to_vmem [thread:$0]  (!%p4685_p6), %s5236_s4, 2048, %s315_s26, [#allocation8], %s4582_s22, %s4582_s22, %s4583_s28  }
  0x44   : > { %p4457_p10 = pneg %p4456_p11 }
  0x46   : > { %p4464_p0 = pnand %p4463_p13, %p4457_p10 }
  0x48   : > { %4467 = shalt.err (!%p4464_p0)
}
  0x49   : > { %3944 = dma.hbm_to_vmem [thread:$0]  (!%p4685_p6), %s5220_s8, 8192, %s347_s12, [#allocation11], %s4582_s22, %s4582_s22, %s4583_s28  }
  0x4a   : > { %s3399_s24 = sadd.s32 4294967294, %s4572_s16   ;;  %s4730_s23 = sadd.s32 1, %s4572_s16  }
  0x4b   : > { %s57_s25 = sadd.s32 1, %s4568_s15  ;;  %s54_s26 = ssub.s32 %s4572_s16, %s4730_s23 }
  0x4c   : > { %p64_p7 = scmp.ne.s32.totalorder %s4568_s15, %s4564_s14  ;;  %p55_p2 = scmp.eq.s32.totalorder %s54_s26, 0 }
  0x4d   : > { %p65_p5 = scmp.eq.s32.totalorder %s4572_s16, 0  ;;  %p70_p8 = scmp.ne.s32.totalorder %s4564_s14, %s4560_s13 }
  0x4e   : > { %p267_p9 = scmp.eq.s32.totalorder %s4671_s19, 1  ;;  %p273_p4 = scmp.eq.s32.totalorder %s3399_s24, 1 }
  0x4f   : > { %s4742_s27 = scalar_select %p55_p2, %s4568_s15, %s57_s25  }
  0x50   : > { %p66_p11 = por %p65_p5, %p64_p7  ;;  %p4746_p10 = por %p5223_p1, %p70_p8 }
  0x51   : > { %p4750_p6 = por %p267_p9, %p64_p7  ;;  %p3958_p12 = scmp.lt.s32.totalorder %s4572_s16, 2 }
  0x52   : > { %s5237_s29 = scalar_select %p4746_p10, 1, 0 }
  0x53   : > { %s5238_s22 = scalar_select %p4750_p6, 1, 0 }
  0x54   : > { %s363_s28 = sand.u32 1, %s4568_s15   ;;  %p4756_p13 = por %p273_p4, %p70_p8 }
  0x55   : > { %s3407_s11 = sshll.u32 %s363_s28, 4  ;;  %s3635_s12 = sshll.u32 %s4572_s16, 8 }
  0x56   : > { %s5239_s30 = scalar_select %p4756_p13, 1, 0 }
  0x57   : > { %s4764_s21 = scalar_lea.hbm %s5213_s1, %s3635_s12  ;;  %s367_s25 = scalar_lea.vmem [#allocation6], %s3407_s11 }
  0x58   : > { %s374_s26 = sshll.u32 %s367_s25, 4  ;;  %p4766_p0 = pnand %p3958_p12, %p66_p11  ;;  %s4770_s26 = int_to_ptr.vmem [resolvable:$true] %s374_s26 }
  0x59   : > { %s4772_s0 = scalar_lea.sflag [#allocation3], %s363_s28  ;;  %s4468_s3 = scalar_lea.hbm %s4764_s21, 256 }
  0x5a   : > { %p4469_p7 = scmp.ne.s32.totalorder %s4764_s21, %s4468_s3  ;;  %p4470_p2 = pneg %p4766_p0 }
  0x5b   : > { %s4473_s11 = scalar_lea.hbm %s5213_s1, 512  ;;  %p4474_p9 = scmp.lt.s32.totalorder %s4764_s21, %s5213_s1 }
  0x5c   : > { %p4471_p5 = pnand %p4470_p2, %p4469_p7  ;;  %p4475_p11 = scmp.lt.s32.totalorder %s4473_s11, %s4468_s3 }
  0x5e   : > { %p4472_p8 = pneg %p4471_p5  ;;  %p4476_p4 = por %p4475_p11, %p4474_p9 }
  0x60   : > { %p4477_p12 = pnand %p4476_p4, %p4472_p8 }
  0x62   : > { %4480 = shalt.err (!%p4477_p12)
}
  0x63   : > { %s4481_s28 = scalar_lea.vmem %s4770_s26, 256  ;;  %s4585_s4 = smov [#allocation6]  }
  0x64   : > { %p4482_p1 = scmp.ne.s32.totalorder %s4770_s26, %s4481_s28  ;;  %s4486_s6 = sshll.u32 %s4585_s4, 4  ;;  %s4487_s6 = int_to_ptr.vmem [resolvable:$false] %s4486_s6 }
  0x65   : > { %s4488_s12 = scalar_lea.vmem %s4487_s6, 512  ;;  %p4489_p5 = scmp.lt.s32.totalorder %s4770_s26, %s4487_s6 }
  0x66   : > { %p4484_p13 = pnand %p4482_p1, %p4470_p2  ;;  %p4490_p6 = scmp.lt.s32.totalorder %s4488_s12, %s4481_s28 }
  0x68   : > { %p4485_p7 = pneg %p4484_p13  ;;  %p4491_p10 = por %p4490_p6, %p4489_p5 }
  0x6a   : > { %p4492_p3 = pnand %p4491_p10, %p4485_p7 }
  0x6c   : > { %4495 = shalt.err (!%p4492_p3)
}
  0x6d   : > { %s4586_s3 = smov 128   ;;  %s4587_s17 = smov 8  }
  0x6e   : > { %3948 = dma.hbm_to_vmem [thread:$0]  (!%p4766_p0), %s4764_s21, 256, %s4770_s26, %s4772_s0, %s4586_s3, %s4586_s3, %s4587_s17  }
  0x6f   : > { %p5241_p1 = scmp.ne.s32.totalorder %s5231_s20, 0 }
  0x70   : > { %p5242_p13 = scmp.eq.s32.totalorder (!%p5241_p1), %s4671_s19, 0 }
  0x71   : > { %392 = sbr.rel (%p5241_p1) target bundleno = 5381 (0x1505), region = 60 }
  0x76   : > { %4539 = dma.done.wait (%p5242_p13), [#allocation5], 16   ;;  %p5243_p2 = pmov %p5242_p13 }
  0x77   : > { %s4800_s4 = sand.u32 1, %s4564_s14   ;;  %p5244_p3 = scmp.ne.s32.totalorder %s5237_s29, 0 }
  0x78   : > { %4541 = vsyncadd (%p5243_p2), [#allocation5], 4294967280  ;;  %s3412_s6 = sshll.u32 %s4800_s4, 4  ;;  %s399_s11 = scalar_lea.sflag [#allocation3], %s4800_s4 }
  0x79   : > { %s4806_s0 = scalar_lea.vmem [#allocation6], %s3412_s6 }
  0x7a   : > { %4543 = dma.done.wait (%p5244_p3), %s399_s11, 256  }
  0x7b   : > { %4545 = vsyncadd (%p5244_p3), %s399_s11, 4294967040  ;;  %p5245_p10 = pmov %p5243_p2 }
  0x7c   : > { %p5246_p6 = pmov %p5243_p2 }
  0x7d   : > { %4547 = dma.done.wait (%p5245_p10), [#allocation8], 8192  }
  0x7e   : > { %4549 = vsyncadd (%p5246_p6), [#allocation8], 4294959104  ;;  %p5247_p0 = pmov %p5243_p2 }
  0x80   : > { %4551 = dma.done.wait (%p5247_p0), [#allocation11], 16384   ;;  %p5248_p8 = pmov %p5247_p0 }
  0x82   : > { %4553 = vsyncadd (%p5248_p8), [#allocation11], 4294950912 }
  0x83   : > { %423 = sfence }
  0x84   : > { %v4821_v0 = vld [vmem:[%s4806_s0] sm:$0xff]  ;;  %v4824_v1 = vld [vmem:[%s4806_s0 + $0x8] sm:$0xff]  ;;  %v4588_v4 = vmov 0.0   ;;  %v4589_v26 = vmov 0   ;;  %vm4590_vm0 = vmmov 0   ;;  %s474_s20 = sld [smem:[#allocation2]] }
  0x85   : > { %v475_v2 = vmul.f32 %v4821_v0, %v4821_v0  ;;  %v4026_v3 = vld [vmem:[#allocation7 + $0xac] ss:$12 sps:$4 sm:$0xff]   ;;  %3777 = vmatprep.subr.bf16.mxu1 %v4588_v4  ;;  %v4028_v5 = vld [vmem:[#allocation7 + $0xa8] ss:$12 sps:$4 sm:$0xff]   ;;  %v4029_v6 = vld [vmem:[#allocation7 + $0xb0] ss:$12 sps:$4 sm:$0xff]   ;;  %v476_v7 = vmul.f32 %v4824_v1, %v4824_v1  ;;  %685 = vmatprep.mubr.bf16.mxu0 %v4589_v26 }
  0x86   : > { %653 = vmatprep.subr.bf16.mxu0 %v4026_v3  ;;  %3778 = vmatpush3.bf16.msra.mxu1 %v4029_v6  ;;  %v4030_v8 = vld [vmem:[#allocation7 + $0x94] ss:$12 sps:$4 sm:$0xff]   ;;  %v4032_v9 = vld [vmem:[#allocation7 + $0x90] ss:$12 sps:$4 sm:$0xff]   ;;  %v4033_v10 = vld [vmem:[#allocation7 + $0x98] ss:$12 sps:$4 sm:$0xff]  }
  0x87   : > { %477 = vadd.xlane.f32.xlu0 %v475_v2  ;;  %654 = vmatpush1.bf16.msra.mxu0 %v4028_v5  ;;  %v4034_v11 = vld [vmem:[#allocation7 + $0x7c] ss:$12 sps:$4 sm:$0xff]   ;;  %v4036_v12 = vld [vmem:[#allocation7 + $0x78] ss:$12 sps:$4 sm:$0xff]   ;;  %v4037_v13 = vld [vmem:[#allocation7 + $0x80] ss:$12 sps:$4 sm:$0xff]  }
  0x88   : > { %3779 = vmatprep.subr.bf16.mxu1 %v4588_v4  ;;  %655 = vmatprep.subr.bf16.mxu0 %v4030_v8  ;;  %v4038_v14 = vld [vmem:[#allocation7 + $0x64] ss:$12 sps:$4 sm:$0xff]   ;;  %v4040_v15 = vld [vmem:[#allocation7 + $0x60] ss:$12 sps:$4 sm:$0xff]   ;;  %v4041_v16 = vld [vmem:[#allocation7 + $0x68] ss:$12 sps:$4 sm:$0xff]  }
  0x89   : > { %v4042_v17 = vld [vmem:[#allocation7 + $0x4c] ss:$12 sps:$4 sm:$0xff]   ;;  %v4044_v18 = vld [vmem:[#allocation7 + $0x48] ss:$12 sps:$4 sm:$0xff]   ;;  %v4045_v19 = vld [vmem:[#allocation7 + $0x50] ss:$12 sps:$4 sm:$0xff]   ;;  %3793 = vmatprep.mubr.msk.bf16.mxu1 %vm4590_vm0, %v4588_v4 }
  0x8a   : > { %3780 = vmatpush3.bf16.msra.mxu1 %v4033_v10  ;;  %v4046_v20 = vld [vmem:[#allocation7 + $0x34] ss:$12 sps:$4 sm:$0xff]   ;;  %v4048_v21 = vld [vmem:[#allocation7 + $0x30] ss:$12 sps:$4 sm:$0xff]   ;;  %v4049_v22 = vld [vmem:[#allocation7 + $0x38] ss:$12 sps:$4 sm:$0xff]   ;;  %v487_v37 = vstv %s474_s20 }
  0x8b   : > { %479 = vadd.xlane.f32.xlu0 %v476_v7  ;;  %656 = vmatpush1.bf16.msra.mxu0 %v4032_v9  ;;  %v4050_v23 = vld [vmem:[#allocation7 + $0x1c] ss:$12 sps:$4 sm:$0xff]   ;;  %v4052_v24 = vld [vmem:[#allocation7 + $0x18] ss:$12 sps:$4 sm:$0xff]   ;;  %v4053_v25 = vld [vmem:[#allocation7 + $0x20] ss:$12 sps:$4 sm:$0xff]  }
  0x8c   : > { %3781 = vmatprep.subr.bf16.mxu1 %v4588_v4  ;;  %657 = vmatprep.subr.bf16.mxu0 %v4034_v11  ;;  %v4054_v27 = vld [vmem:[#allocation7 + $0x4] ss:$12 sps:$4 sm:$0xff]   ;;  %v4056_v28 = vld [vmem:[#allocation7] ss:$12 sps:$4 sm:$0xff]   ;;  %v4057_v29 = vld [vmem:[#allocation7 + $0x8] ss:$12 sps:$4 sm:$0xff]  }
  0x8d   : > { %vm740_vm1 = vcmask 523264   ;;  %p460_p9 = scmp.lt.s32.totalorder %s4671_s19, 1  ;;  %vm788_vm2 = vcmask 130048   ;;  %s4591_s18 = smov 64  }
  0x8e   : > { %3782 = vmatpush3.bf16.msra.mxu1 %v4037_v13  ;;  %s3456_s12 = sld [smem:[#allocation2 + $0x1]]  ;;  %s3636_s3 = sshll.u32 %s4671_s19, 8 }
  0x8f   : > { %658 = vmatpush1.bf16.msra.mxu0 %v4036_v12  ;;  %3783 = vmatprep.subr.bf16.mxu1 %v4588_v4  ;;  %s461_s29 = scalar_select %p460_p9, %s4671_s19, 1 }
  0x90   : > { %659 = vmatprep.subr.bf16.mxu0 %v4038_v14  ;;  %s3522_s20 = sld [smem:[#allocation2 + $0x2]]  ;;  %s458_s17 = scalar_lea.vmem [#allocation13], %s3412_s6 }
  0x91   : > { %s4863_s24 = scalar_lea.vmem %s5214_s2, %s461_s29  ;;  %s3561_s26 = sld [smem:[#allocation2 + $0x3]] }
  0x92   : > { %3784 = vmatpush3.bf16.msra.mxu1 %v4041_v16  ;;  %v3418_v56 = vld [vmem:[%s4863_s24] ss:$0 sm:$0xff]  ;;  %s3267_s11 = sshll.u32 %s458_s17, 4  ;;  %s5167_s29 = scalar_lea.hbm %s5222_s10, %s3636_s3  ;;  %s5169_s11 = int_to_ptr.vmem [resolvable:$true] %s3267_s11 }
  0x93   : > { %660 = vmatpush1.bf16.msra.mxu0 %v4040_v15  ;;  %3785 = vmatprep.subr.bf16.mxu1 %v4588_v4  ;;  %s3254_s21 = scalar_lea.sflag [#allocation4], %s4800_s4  ;;  %s4496_s19 = scalar_lea.vmem %s5169_s11, 256 }
  0x94   : > { %661 = vmatprep.subr.bf16.mxu0 %v4042_v17  ;;  %p4497_p11 = scmp.ne.s32.totalorder %s5169_s11, %s4496_s19  ;;  %p5249_p4 = scmp.ne.s32.totalorder %s5238_s22, 0 }
  0x95   : > { %s4592_s6 = smov [#allocation13]  }
  0x96   : > { %3786 = vmatpush3.bf16.msra.mxu1 %v4045_v19  ;;  %p4498_p12 = pnand %p4497_p11, %p5249_p4 }
  0x97   : > { %662 = vmatpush1.bf16.msra.mxu0 %v4044_v18  ;;  %3787 = vmatprep.subr.bf16.mxu1 %v4588_v4 }
  0x98   : > { %663 = vmatprep.subr.bf16.mxu0 %v4046_v20  ;;  %p4499_p7 = pneg %p4498_p12 }
  0x9a   : > { %3788 = vmatpush3.bf16.msra.mxu1 %v4049_v22 }
  0x9b   : > { %664 = vmatpush1.bf16.msra.mxu0 %v4048_v21  ;;  %3789 = vmatprep.subr.bf16.mxu1 %v4588_v4 }
  0x9c   : > { %665 = vmatprep.subr.bf16.mxu0 %v4050_v23 }
  0x9e   : > { %3790 = vmatpush3.bf16.msra.mxu1 %v4053_v25 }
  0x9f   : > { %666 = vmatpush1.bf16.msra.mxu0 %v4052_v24  ;;  %3791 = vmatprep.subr.bf16.mxu1 %v4588_v4 }
  0xa0   : > { %667 = vmatprep.subr.bf16.mxu0 %v4054_v27 }
  0xa2   : > { %3792 = vmatpush3.bf16.msra.mxu1 %v4057_v29 }
  0xa3   : > { %668 = vmatpush1.bf16.msra.mxu0 %v4056_v28  ;;  %3797 = vmatprep.subr.bf16.mxu1 %v4588_v4 }
  0xa4   : > { %3821 = vmatprep.subr.bf16.mxu0 %v4588_v4 }
 0x110   : > { %v478_v30 = vpop.xlane.xlu0 %477 }
 0x111   : > { %v481_v31 = vmul.f32 0.0078125, %v478_v30 }
 0x113   : > { %v483_v32 = vmax.f32 %v481_v31, 1e-10 }
 0x114   : > { %v480_v33 = vpop.xlane.xlu0 %479 }
 0x115   : > { %4266 = vrsqrt.f32 %v483_v32  ;;  %v482_v34 = vmul.f32 0.0078125, %v480_v33 }
 0x117   : > { %v484_v35 = vmax.f32 %v482_v34, 1e-10 }
 0x119   : > { %4268 = vrsqrt.f32 %v484_v35 }
 0x122   : > { %v4267_v36 = vpop.eup %4266 }
 0x123   : > { %v488_v38 = vmul.f32 %v4267_v36, %v487_v37 }
 0x125   : > { %v490_v41 = vmul.f32 %v488_v38, %v4821_v0 }
 0x126   : > { %v4269_v39 = vpop.eup %4268 }
 0x127   : > { %v489_v40 = vmul.f32 %v4269_v39, %v487_v37 }
 0x129   : > { %v491_v42 = vmul.f32 %v489_v40, %v4824_v1 }
 0x12b   : > { %v492_v43 = vpack.c.bf16 %v491_v42, %v490_v41 }
 0x12d   : > { %686 = vmatmul.mubr.bf16.vlgmr.msra.gmra.mxu0 %v492_v43  ;;  %3794 = vmatmul.mubr.bf16.vlgmr.msra.gmra.mxu1 %v492_v43 }
 0x12e   : > { %3799 = vmatprep.mubr.msk.bf16.mxu1 %vm4590_vm0, %v4588_v4  ;;  %3837 = vmatprep.mubr.msk.bf16.mxu0 %vm4590_vm0, %v4588_v4 }
 0x1ed   : > { %v687_v44 = vpop.f32.mrf.mxu0  ;;  %v730_v45 = vpop.f32.mrf.mxu1 }
 0x1ef   : > { %v689_v46 = vpop.f32.mrf.mxu0  ;;  %v3795_v47 = vpop.f32.mrf.mxu1 }
 0x1f1   : > { %v691_v48 = vpop.f32.mrf.mxu0  ;;  %v733_v49 = vpop.f32.mrf.mxu1 }
 0x1f2   : > { %v737_v54 = vpack.c.bf16 %v691_v48, %v687_v44  ;;  %v4851_v55 = vpack.c.bf16 %v733_v49, %v730_v45 }
 0x1f3   : > { %v693_v50 = vpop.f32.mrf.mxu0  ;;  %v3796_v51 = vpop.f32.mrf.mxu1 }
 0x1f4   : > { %v738_v52 = vpack.c.bf16 %v693_v50, %v689_v46 }
 0x1f6   : > { %v745_v53 = vsel %vm740_vm1, %v738_v52, 0 }
 0x1f7   : > { %3798 = vmatpush3.bf16.xpose.msra.mxu1 %v745_v53  ;;  %v4058_v53 = vld [vmem:[#allocation9 + $0x38] sm:$0xff]  }
 0x1f8   : > { %3803 = vmatprep.subr.bf16.mxu1 %v4588_v4  ;;  %3822 = vmatpush3.bf16.msra.mxu0 %v4058_v53  ;;  %v4108_v53 = vld [vmem:[#allocation10] ss:$16 sps:$4 sm:$0xff]  }
 0x1f9   : > { %3823 = vmatprep.subr.bf16.mxu0 %v4588_v4 }
 0x1fe   : > { %3800 = vmatmul.mubr.msk.bf16.vlgmr.msra.gmra.mxu1 %vm740_vm1, %v737_v54 }
 0x1ff   : > { %3804 = vmatpush3.bf16.msra.mxu1 %v4851_v55  ;;  %3805 = vmatprep.mubr.msk.bf16.mxu1 %vm4590_vm0, %v4588_v4 }
 0x200   : > { %3809 = vmatprep.subr.bf16.mxu1 %v4588_v4 }
 0x2be   : > { %v781_v57 = vpop.f32.mrf.mxu1 }
 0x2bf   : > { %v782_v58 = vadd.f32 %v3418_v56, %v781_v57  ;;  %v4062_v57 = vld [vmem:[#allocation9 + $0x18] sm:$0xff]  }
 0x2c0   : > { %v3801_v59 = vpop.f32.mrf.mxu1 }
 0x2c1   : > { %v789_v60 = vsel %vm788_vm2, %v782_v58, -inf  ;;  %v4064_v59 = vld [vmem:[#allocation9 + $0x8] sm:$0xff]  }
 0x2c2   : > { %v784_v61 = vpop.f32.mrf.mxu1  ;;  %790 = vmax.xlane.f32.xlu1 %v789_v60  ;;  %v4065_v60 = vld [vmem:[#allocation9] sm:$0xff]  }
 0x2c3   : > { %v785_v62 = vadd.f32 %v3418_v56, %v784_v61 }
 0x2c4   : > { %v3802_v63 = vpop.f32.mrf.mxu1 }
 0x2c5   : > { %v792_v0 = vsel %vm788_vm2, %v785_v62, -inf }
 0x2c6   : > { %793 = vmax.xlane.f32.xlu1 %v792_v0 }
 0x34b   : > { %v791_v1 = vpop.xlane.xlu1 %790 }
 0x34c   : > { %v795_v2 = vsub.f32 %v782_v58, %v791_v1  ;;  %v4063_v58 = vld [vmem:[#allocation9 + $0x10] sm:$0xff]  }
 0x34e   : > { %v797_v3 = vmul.f32 1.442695, %v795_v2 }
 0x34f   : > { %v794_v5 = vpop.xlane.xlu1 %793 }
 0x350   : > { %4270 = vpow2.f32 %v797_v3  ;;  %v796_v6 = vsub.f32 %v785_v62, %v794_v5 }
 0x352   : > { %v799_v7 = vmul.f32 1.442695, %v796_v6 }
 0x354   : > { %4272 = vpow2.f32 %v799_v7 }
 0x35d   : > { %v4271_v8 = vpop.eup %4270 }
 0x35e   : > { %v801_v9 = vsel %vm788_vm2, %v4271_v8, 0.0 }
 0x35f   : > { %802 = vadd.xlane.f32.xlu0 %v801_v9  ;;  %v4066_v9 = vld [vmem:[#allocation10 + $0xe0] ss:$16 sps:$4 sm:$0xff]  }
 0x361   : > { %v4273_v10 = vpop.eup %4272 }
 0x362   : > { %v804_v11 = vsel %vm788_vm2, %v4273_v10, 0.0 }
 0x363   : > { %805 = vadd.xlane.f32.xlu1 %v804_v11  ;;  %v4069_v11 = vld [vmem:[#allocation10 + $0xe8] ss:$16 sps:$4 sm:$0xff]  }
 0x374   : > { %857 = vrot.lane.b32.xlu1 %v737_v54, %s4591_s18  ;;  %v4059_v54 = vld [vmem:[#allocation9 + $0x30] sm:$0xff]  }
 0x375   : > { %860 = vrot.lane.b32.xlu0 %v738_v52, %s4591_s18  ;;  %3824 = vmatpush3.bf16.msra.mxu0 %v4059_v54  ;;  %v4111_v54 = vld [vmem:[#allocation10 + $0x8] ss:$16 sps:$4 sm:$0xff]  }
 0x376   : > { %3825 = vmatprep.subr.bf16.mxu0 %v4588_v4 }
 0x3e8   : > { %v803_v12 = vpop.xlane.xlu0 %802 }
 0x3e9   : > { %4274 = vrcp.f32 %v803_v12  ;;  %v4071_v12 = vld [vmem:[#allocation10 + $0xec] ss:$16 sps:$4 sm:$0xff]  }
 0x3ec   : > { %v806_v13 = vpop.xlane.xlu1 %805  ;;  %v861_v18 = vpop.permute.xlu0 %860 }
 0x3ed   : > { %4276 = vrcp.f32 %v806_v13  ;;  %v866_v20 = vsel %vm740_vm1, %v861_v18, 0 }
 0x3f0   : > { %v858_v21 = vpop.permute.xlu1 %857 }
 0x3f6   : > { %v4275_v14 = vpop.eup %4274 }
 0x3f7   : > { %v809_v16 = vmul.f32 %v4275_v14, %v4271_v8  ;;  %v3455_v14 = vld [vmem:[%s5217_s5] ss:$0 sm:$0xff] }
 0x3fa   : > { %v4277_v15 = vpop.eup %4276 }
 0x3fb   : > { %v810_v17 = vmul.f32 %v4277_v15, %v4273_v10  ;;  %v4068_v10 = vld [vmem:[#allocation10 + $0xe4] ss:$16 sps:$4 sm:$0xff]  }
 0x3fc   : > { %v4350_v15 = vld [vmem:[%s4806_s0] sm:$0xff] }
 0x3fd   : > { %v811_v19 = vpack.c.bf16 %v810_v17, %v809_v16 }
 0x3ff   : > { %3806 = vmatmul.mubr.msk.bf16.vlgmr.msra.gmra.mxu1 %vm788_vm2, %v811_v19 }
 0x400   : > { %3810 = vmatpush3.bf16.xpose.msra.mxu1 %v866_v20  ;;  %3811 = vmatprep.mubr.msk.bf16.mxu1 %vm4590_vm0, %v4588_v4  ;;  %v4351_v20 = vld [vmem:[%s4806_s0 + $0x8] sm:$0xff] }
 0x401   : > { %3815 = vmatprep.subr.bf16.mxu1 %v4588_v4 }
 0x407   : > { %3812 = vmatmul.mubr.msk.bf16.vlgmr.msra.gmra.mxu1 %vm740_vm1, %v858_v21 }
 0x408   : > { %3817 = vmatprep.mubr.msk.bf16.mxu1 %vm4590_vm0, %v4588_v4 }
 0x4bf   : > { %v4880_v22 = vpop.f32.mrf.mxu1 }
 0x4c1   : > { %v3807_v23 = vpop.f32.mrf.mxu1 }
 0x4c3   : > { %v4882_v24 = vpop.f32.mrf.mxu1 }
 0x4c5   : > { %v3808_v25 = vpop.f32.mrf.mxu1 }
 0x4c7   : > { %v902_v27 = vpop.f32.mrf.mxu1 }
 0x4c8   : > { %v903_v28 = vadd.f32 %v3418_v56, %v902_v27  ;;  %v4074_v27 = vld [vmem:[#allocation10 + $0xc4] ss:$16 sps:$4 sm:$0xff]  }
 0x4c9   : > { %v3813_v29 = vpop.f32.mrf.mxu1 }
 0x4ca   : > { %v909_v30 = vsel %vm788_vm2, %v903_v28, -inf  ;;  %v4072_v29 = vld [vmem:[#allocation10 + $0xc0] ss:$16 sps:$4 sm:$0xff]  }
 0x4cb   : > { %910 = vmax.xlane.f32.xlu1 %v909_v30  ;;  %v905_v31 = vpop.f32.mrf.mxu1  ;;  %v4075_v30 = vld [vmem:[#allocation10 + $0xc8] ss:$16 sps:$4 sm:$0xff]  }
 0x4cc   : > { %v906_v32 = vadd.f32 %v3418_v56, %v905_v31  ;;  %v4061_v56 = vld [vmem:[#allocation9 + $0x20] sm:$0xff]  }
 0x4cd   : > { %v3814_v33 = vpop.f32.mrf.mxu1  ;;  %v4080_v31 = vld [vmem:[#allocation10 + $0xa4] ss:$16 sps:$4 sm:$0xff]  }
 0x4ce   : > { %v912_v34 = vsel %vm788_vm2, %v906_v32, -inf  ;;  %v4078_v33 = vld [vmem:[#allocation10 + $0xa0] ss:$16 sps:$4 sm:$0xff]  }
 0x4cf   : > { %913 = vmax.xlane.f32.xlu0 %v912_v34  ;;  %v4081_v34 = vld [vmem:[#allocation10 + $0xa8] ss:$16 sps:$4 sm:$0xff]  }
 0x554   : > { %v911_v35 = vpop.xlane.xlu1 %910 }
 0x555   : > { %v915_v36 = vsub.f32 %v903_v28, %v911_v35  ;;  %v4077_v28 = vld [vmem:[#allocation10 + $0xcc] ss:$16 sps:$4 sm:$0xff]   ;;  %v4086_v35 = vld [vmem:[#allocation10 + $0x84] ss:$16 sps:$4 sm:$0xff]  }
 0x557   : > { %v917_v37 = vmul.f32 1.442695, %v915_v36  ;;  %v4089_v36 = vld [vmem:[#allocation10 + $0x8c] ss:$16 sps:$4 sm:$0xff]  }
 0x558   : > { %v914_v38 = vpop.xlane.xlu0 %913 }
 0x559   : > { %4278 = vpow2.f32 %v917_v37  ;;  %v916_v39 = vsub.f32 %v906_v32, %v914_v38  ;;  %v4083_v32 = vld [vmem:[#allocation10 + $0xac] ss:$16 sps:$4 sm:$0xff]   ;;  %v4084_v37 = vld [vmem:[#allocation10 + $0x80] ss:$16 sps:$4 sm:$0xff]   ;;  %v4087_v38 = vld [vmem:[#allocation10 + $0x88] ss:$16 sps:$4 sm:$0xff]  }
 0x55b   : > { %v919_v40 = vmul.f32 1.442695, %v916_v39  ;;  %v4092_v39 = vld [vmem:[#allocation10 + $0x64] ss:$16 sps:$4 sm:$0xff]  }
 0x55d   : > { %4280 = vpow2.f32 %v919_v40  ;;  %v4095_v40 = vld [vmem:[#allocation10 + $0x6c] ss:$16 sps:$4 sm:$0xff]  }
 0x566   : > { %v4279_v41 = vpop.eup %4278 }
 0x567   : > { %v921_v42 = vsel %vm788_vm2, %v4279_v41, 0.0 }
 0x568   : > { %922 = vadd.xlane.f32.xlu0 %v921_v42  ;;  %v4093_v42 = vld [vmem:[#allocation10 + $0x68] ss:$16 sps:$4 sm:$0xff]  }
 0x56a   : > { %v4281_v43 = vpop.eup %4280 }
 0x56b   : > { %v924_v44 = vsel %vm788_vm2, %v4281_v43, 0.0 }
 0x56c   : > { %925 = vadd.xlane.f32.xlu1 %v924_v44  ;;  %v4101_v44 = vld [vmem:[#allocation10 + $0x4c] ss:$16 sps:$4 sm:$0xff]  }
 0x57e   : > { %933 = vrot.lane.b32.xlu0 %v4851_v55, %s4591_s18  ;;  %v4060_v55 = vld [vmem:[#allocation9 + $0x28] sm:$0xff]  }
 0x57f   : > { %3826 = vmatpush3.bf16.msra.mxu0 %v4060_v55 }
 0x580   : > { %3827 = vmatprep.subr.bf16.mxu0 %v4588_v4 }
 0x583   : > { %3828 = vmatpush3.bf16.msra.mxu0 %v4061_v56 }
 0x584   : > { %3829 = vmatprep.subr.bf16.mxu0 %v4588_v4 }
 0x587   : > { %3830 = vmatpush3.bf16.msra.mxu0 %v4062_v57 }
 0x588   : > { %3831 = vmatprep.subr.bf16.mxu0 %v4588_v4 }
 0x58b   : > { %3832 = vmatpush3.bf16.msra.mxu0 %v4063_v58 }
 0x58c   : > { %3833 = vmatprep.subr.bf16.mxu0 %v4588_v4 }
 0x58f   : > { %3834 = vmatpush3.bf16.msra.mxu0 %v4064_v59 }
 0x590   : > { %3835 = vmatprep.subr.bf16.mxu0 %v4588_v4 }
 0x593   : > { %3836 = vmatpush3.bf16.msra.mxu0 %v4065_v60 }
 0x594   : > { %1383 = vmatprep.subr.bf16.mxu0 %v4071_v12  ;;  %v4120_v12 = vld [vmem:[#allocation12 + $0x30] sm:$0xff]  }
 0x5f1   : > { %v923_v45 = vpop.xlane.xlu0 %922 }
 0x5f2   : > { %4282 = vrcp.f32 %v923_v45  ;;  %v4096_v45 = vld [vmem:[#allocation10 + $0x40] ss:$16 sps:$4 sm:$0xff]  }
 0x5f5   : > { %v926_v46 = vpop.xlane.xlu1 %925  ;;  %v934_v47 = vpop.permute.xlu0 %933 }
 0x5f6   : > { %4284 = vrcp.f32 %v926_v46  ;;  %3816 = vmatpush3.bf16.msra.mxu1 %v934_v47  ;;  %v4099_v46 = vld [vmem:[#allocation10 + $0x48] ss:$16 sps:$4 sm:$0xff]   ;;  %v4104_v47 = vld [vmem:[#allocation10 + $0x24] ss:$16 sps:$4 sm:$0xff]  }
 0x5f7   : > { %1340 = vmatprep.subr.bf16.mxu1 %v4068_v10  ;;  %v4118_v10 = vld [vmem:[#allocation12 + $0x70] sm:$0xff]  }
 0x5ff   : > { %v4283_v48 = vpop.eup %4282 }
 0x600   : > { %v929_v50 = vmul.f32 %v4283_v48, %v4279_v41  ;;  %v4090_v41 = vld [vmem:[#allocation10 + $0x60] ss:$16 sps:$4 sm:$0xff]   ;;  %v4107_v48 = vld [vmem:[#allocation10 + $0x2c] ss:$16 sps:$4 sm:$0xff]  }
 0x603   : > { %v4285_v49 = vpop.eup %4284 }
 0x604   : > { %v930_v51 = vmul.f32 %v4285_v49, %v4281_v43  ;;  %v4098_v43 = vld [vmem:[#allocation10 + $0x44] ss:$16 sps:$4 sm:$0xff]   ;;  %v4102_v49 = vld [vmem:[#allocation10 + $0x20] ss:$16 sps:$4 sm:$0xff]  }
 0x606   : > { %v931_v52 = vpack.c.bf16 %v930_v51, %v929_v50  ;;  %v4105_v50 = vld [vmem:[#allocation10 + $0x28] ss:$16 sps:$4 sm:$0xff]   ;;  %v4110_v51 = vld [vmem:[#allocation10 + $0x4] ss:$16 sps:$4 sm:$0xff]  }
 0x608   : > { %3818 = vmatmul.mubr.msk.bf16.vlgmr.msra.gmra.mxu1 %vm788_vm2, %v931_v52  ;;  %v4113_v52 = vld [vmem:[#allocation10 + $0xc] ss:$16 sps:$4 sm:$0xff]  }
 0x609   : > { %1372 = vmatprep.mubr.bf16.mxu1 %v4589_v26  ;;  %1341 = vmatpush1.bf16.msra.mxu1 %v4066_v9  ;;  %v4117_v9 = vld [vmem:[#allocation12 + $0xb8] sm:$0xff]  }
 0x60a   : > { %1342 = vmatprep.subr.bf16.mxu1 %v4074_v27  ;;  %v4132_v27 = vld [vmem:[#allocation12 + $0x18] sm:$0xff]  }
 0x60d   : > { %1343 = vmatpush1.bf16.msra.mxu1 %v4072_v29  ;;  %v4134_v29 = vld [vmem:[#allocation12 + $0x50] sm:$0xff]  }
 0x60e   : > { %1344 = vmatprep.subr.bf16.mxu1 %v4080_v31  ;;  %v4136_v31 = vld [vmem:[#allocation12 + $0x10] sm:$0xff]  }
 0x611   : > { %1345 = vmatpush1.bf16.msra.mxu1 %v4078_v33  ;;  %v4138_v33 = vld [vmem:[#allocation12 + $0x48] sm:$0xff]  }
 0x612   : > { %1346 = vmatprep.subr.bf16.mxu1 %v4086_v35  ;;  %v4140_v35 = vld [vmem:[#allocation12 + $0x8] sm:$0xff]  }
 0x615   : > { %1347 = vmatpush1.bf16.msra.mxu1 %v4084_v37  ;;  %v4142_v37 = vld [vmem:[#allocation12 + $0x40] sm:$0xff]  }
 0x616   : > { %1348 = vmatprep.subr.bf16.mxu1 %v4092_v39  ;;  %v4144_v39 = vld [vmem:[#allocation12] sm:$0xff]  }
 0x619   : > { %1349 = vmatpush1.bf16.msra.mxu1 %v4090_v41  ;;  %v1160_v41 = vlaneseq }
 0x61a   : > { %1350 = vmatprep.subr.bf16.mxu1 %v4098_v43 }
 0x61d   : > { %1351 = vmatpush1.bf16.msra.mxu1 %v4096_v45  ;;  %v1158_v45 = vld [vmem:[%s5219_s7] sm:$0xf] }
 0x61e   : > { %1352 = vmatprep.subr.bf16.mxu1 %v4104_v47 }
 0x621   : > { %1353 = vmatpush1.bf16.msra.mxu1 %v4102_v49 }
 0x622   : > { %1354 = vmatprep.subr.bf16.mxu1 %v4110_v51 }
 0x625   : > { %1355 = vmatpush1.bf16.msra.mxu1 %v4108_v53 }
 0x6c8   : > { %v973_v61 = vpop.f32.mrf.mxu1 }
 0x6ca   : > { %v3819_v62 = vpop.f32.mrf.mxu1 }
 0x6cb   : > { %v1120_v62 = vstv %s3456_s12  ;;  %s3629_s12 = sld [smem:[#allocation2 + $0x4]] }
 0x6cc   : > { %v976_v63 = vpop.f32.mrf.mxu1 }
 0x6cd   : > { %v4016_v0 = vpack.i.bf16 %v976_v63, %v973_v61 }
 0x6ce   : > { %v3820_v1 = vpop.f32.mrf.mxu1 }
 0x6cf   : > { %4017 = vrot.lane.b32.xlu1 %v4016_v0, %s4591_s18 }
 0x741   : > { %v4018_v2 = vpop.permute.xlu1 %4017 }
 0x742   : > { %v4020_v3 = vunpack.i.h.bf16 %v4018_v2  ;;  %v4019_v5 = vunpack.i.l.bf16 %v4018_v2 }
 0x744   : > { %v989_v6 = vsel %vm740_vm1, %v4882_v24, %v4020_v3  ;;  %v988_v7 = vsel %vm740_vm1, %v4880_v22, %v4019_v5 }
 0x745   : > { %v990_v8 = vpack.c.bf16 %v989_v6, %v988_v7  ;;  %v4114_v6 = vld [vmem:[#allocation12 + $0x78] sm:$0xff]  }
 0x746   : > { %v4115_v7 = vld [vmem:[#allocation12 + $0xf8] sm:$0xff]   ;;  %3663 = vmatprep.subr.bf16.mxu1 %v4114_v6 }
 0x747   : > { %3838 = vmatmul.mubr.bf16.vlgmr.msra.gmra.mxu0 %v990_v8  ;;  %v4116_v8 = vld [vmem:[#allocation12 + $0x38] sm:$0xff]  }
 0x748   : > { %1415 = vmatprep.mubr.bf16.mxu0 %v4589_v26  ;;  %1384 = vmatpush1.bf16.msra.mxu0 %v4069_v11  ;;  %v4119_v11 = vld [vmem:[#allocation12 + $0xf0] sm:$0xff]  }
 0x749   : > { %1385 = vmatprep.subr.bf16.mxu0 %v4077_v28  ;;  %v4133_v28 = vld [vmem:[#allocation12 + $0x98] sm:$0xff]  }
 0x74c   : > { %1386 = vmatpush1.bf16.msra.mxu0 %v4075_v30  ;;  %v4135_v30 = vld [vmem:[#allocation12 + $0xd0] sm:$0xff]  }
 0x74d   : > { %1387 = vmatprep.subr.bf16.mxu0 %v4083_v32  ;;  %v4137_v32 = vld [vmem:[#allocation12 + $0x90] sm:$0xff]  }
 0x750   : > { %1388 = vmatpush1.bf16.msra.mxu0 %v4081_v34  ;;  %v4139_v34 = vld [vmem:[#allocation12 + $0xc8] sm:$0xff]  }
 0x751   : > { %1389 = vmatprep.subr.bf16.mxu0 %v4089_v36  ;;  %v4141_v36 = vld [vmem:[#allocation12 + $0x88] sm:$0xff]  }
 0x754   : > { %1390 = vmatpush1.bf16.msra.mxu0 %v4087_v38  ;;  %v4143_v38 = vld [vmem:[#allocation12 + $0xc0] sm:$0xff]  }
 0x755   : > { %1391 = vmatprep.subr.bf16.mxu0 %v4095_v40  ;;  %v4145_v40 = vld [vmem:[#allocation12 + $0x80] sm:$0xff]  }
 0x758   : > { %1392 = vmatpush1.bf16.msra.mxu0 %v4093_v42  ;;  %v4921_v42 = vshrl.u32 %v1160_v41, 7 }
 0x759   : > { %1393 = vmatprep.subr.bf16.mxu0 %v4101_v44 }
 0x75a   : > { %v1162_v43 = vsub.s32 0, %v4921_v42  ;;  %v1170_v44 = vsub.s32 2, %v4921_v42  ;;  %v1174_v47 = vsub.s32 3, %v4921_v42 }
 0x75c   : > { %1394 = vmatpush1.bf16.msra.mxu0 %v4099_v46  ;;  %v1166_v46 = vsub.s32 1, %v4921_v42  ;;  %v1171_v49 = vrot.slane %v1158_v45, %v1170_v44  ;;  %v1175_v51 = vrot.slane %v1158_v45, %v1174_v47 }
 0x75d   : > { %1395 = vmatprep.subr.bf16.mxu0 %v4107_v48  ;;  %v1163_v48 = vrot.slane %v1158_v45, %v1162_v43 }
 0x760   : > { %1396 = vmatpush1.bf16.msra.mxu0 %v4105_v50  ;;  %v1167_v50 = vrot.slane %v1158_v45, %v1166_v46 }
 0x761   : > { %1397 = vmatprep.subr.bf16.mxu0 %v4113_v52 }
 0x764   : > { %1398 = vmatpush1.bf16.msra.mxu0 %v4111_v54 }
 0x765   : > { %3685 = vmatprep.subr.bf16.mxu0 %v4115_v7 }
 0x807   : > { %v1089_v13 = vpop.f32.mrf.mxu0 }
 0x808   : > { %v1096_v16 = vadd.f32 %v4350_v15, %v1089_v13  ;;  %v4121_v13 = vld [vmem:[#allocation12 + $0xb0] sm:$0xff]   ;;  %v4123_v15 = vld [vmem:[#allocation12 + $0xe8] sm:$0xff]  }
 0x809   : > { %v3839_v17 = vpop.f32.mrf.mxu0 }
 0x80a   : > { %v4909_v18 = vadd.f32 %v3455_v14, %v1096_v16  ;;  %v4124_v16 = vld [vmem:[#allocation12 + $0x28] sm:$0xff]  }
 0x80b   : > { %v1092_v19 = vpop.f32.mrf.mxu0  ;;  %v4125_v17 = vld [vmem:[#allocation12 + $0xa8] sm:$0xff]  }
 0x80c   : > { %v1097_v21 = vadd.f32 %v4351_v20, %v1092_v19  ;;  %v1108_v22 = vmul.f32 %v4909_v18, %v4909_v18  ;;  %v4126_v19 = vld [vmem:[#allocation12 + $0x60] sm:$0xff]  }
 0x80d   : > { %v3840_v23 = vpop.f32.mrf.mxu0  ;;  %v4127_v20 = vld [vmem:[#allocation12 + $0xe0] sm:$0xff]  }
 0x80e   : > { %v4914_v24 = vadd.f32 %v3455_v14, %v1097_v21  ;;  %1110 = vadd.xlane.f32.xlu1 %v1108_v22  ;;  %v4122_v14 = vld [vmem:[#allocation12 + $0x68] sm:$0xff]   ;;  %v4128_v21 = vld [vmem:[#allocation12 + $0x20] sm:$0xff]   ;;  %v4130_v23 = vld [vmem:[#allocation12 + $0x58] sm:$0xff]  }
 0x80f   : > { %v4129_v22 = vld [vmem:[#allocation12 + $0xa0] sm:$0xff]  }
 0x810   : > { %v1109_v25 = vmul.f32 %v4914_v24, %v4914_v24 }
 0x812   : > { %1112 = vadd.xlane.f32.xlu0 %v1109_v25  ;;  %v4131_v25 = vld [vmem:[#allocation12 + $0xd8] sm:$0xff]  }
 0x897   : > { %v1111_v55 = vpop.xlane.xlu1 %1110 }
 0x898   : > { %v1114_v56 = vmul.f32 0.0078125, %v1111_v55 }
 0x89a   : > { %v1116_v57 = vmax.f32 %v1114_v56, 1e-10 }
 0x89b   : > { %v1113_v58 = vpop.xlane.xlu0 %1112 }
 0x89c   : > { %4286 = vrsqrt.f32 %v1116_v57  ;;  %v1115_v59 = vmul.f32 0.0078125, %v1113_v58 }
 0x89e   : > { %v1117_v60 = vmax.f32 %v1115_v59, 1e-10 }
 0x8a0   : > { %4288 = vrsqrt.f32 %v1117_v60 }
 0x8a9   : > { %v4287_v61 = vpop.eup %4286 }
 0x8aa   : > { %v1121_v63 = vmul.f32 %v4287_v61, %v1120_v62 }
 0x8ac   : > { %v1123_v2 = vmul.f32 %v1121_v63, %v4909_v18 }
 0x8ad   : > { %v4289_v0 = vpop.eup %4288 }
 0x8ae   : > { %v1122_v1 = vmul.f32 %v4289_v0, %v1120_v62 }
 0x8b0   : > { %v1124_v3 = vmul.f32 %v1122_v1, %v4914_v24 }
 0x8b2   : > { %v1125_v5 = vpack.c.bf16 %v1124_v3, %v1123_v2 }
 0x8b4   : > { %1373 = vmatmul.mubr.bf16.vlgmr.msra.gmra.mxu1 %v1125_v5  ;;  %1416 = vmatmul.mubr.bf16.vlgmr.msra.gmra.mxu0 %v1125_v5 }
 0x8b5   : > { %3664 = vmatpush3.bf16.msra.mxu1 %v4116_v8  ;;  %3686 = vmatpush3.bf16.msra.mxu0 %v4117_v9 }
 0x8b6   : > { %3665 = vmatprep.subr.bf16.mxu1 %v4118_v10  ;;  %3687 = vmatprep.subr.bf16.mxu0 %v4119_v11 }
 0x8b9   : > { %3666 = vmatpush3.bf16.msra.mxu1 %v4120_v12  ;;  %3688 = vmatpush3.bf16.msra.mxu0 %v4121_v13 }
 0x8ba   : > { %3667 = vmatprep.subr.bf16.mxu1 %v4122_v14  ;;  %3689 = vmatprep.subr.bf16.mxu0 %v4123_v15 }
 0x8bd   : > { %3668 = vmatpush3.bf16.msra.mxu1 %v4124_v16  ;;  %3690 = vmatpush3.bf16.msra.mxu0 %v4125_v17 }
 0x8be   : > { %3669 = vmatprep.subr.bf16.mxu1 %v4126_v19  ;;  %3691 = vmatprep.subr.bf16.mxu0 %v4127_v20 }
 0x8c1   : > { %3670 = vmatpush3.bf16.msra.mxu1 %v4128_v21  ;;  %3692 = vmatpush3.bf16.msra.mxu0 %v4129_v22 }
 0x8c2   : > { %3671 = vmatprep.subr.bf16.mxu1 %v4130_v23  ;;  %3693 = vmatprep.subr.bf16.mxu0 %v4131_v25 }
 0x8c5   : > { %3672 = vmatpush3.bf16.msra.mxu1 %v4132_v27  ;;  %3694 = vmatpush3.bf16.msra.mxu0 %v4133_v28 }
 0x8c6   : > { %3673 = vmatprep.subr.bf16.mxu1 %v4134_v29  ;;  %3695 = vmatprep.subr.bf16.mxu0 %v4135_v30 }
 0x8c9   : > { %3674 = vmatpush3.bf16.msra.mxu1 %v4136_v31  ;;  %3696 = vmatpush3.bf16.msra.mxu0 %v4137_v32 }
 0x8ca   : > { %3675 = vmatprep.subr.bf16.mxu1 %v4138_v33  ;;  %3697 = vmatprep.subr.bf16.mxu0 %v4139_v34 }
 0x8cd   : > { %3676 = vmatpush3.bf16.msra.mxu1 %v4140_v35  ;;  %3698 = vmatpush3.bf16.msra.mxu0 %v4141_v36 }
 0x8ce   : > { %3677 = vmatprep.subr.bf16.mxu1 %v4142_v37  ;;  %3699 = vmatprep.subr.bf16.mxu0 %v4143_v38 }
 0x8d1   : > { %3678 = vmatpush3.bf16.msra.mxu1 %v4144_v39  ;;  %3700 = vmatpush3.bf16.msra.mxu0 %v4145_v40 }
 0x8d2   : > { %3841 = vmatprep.subr.bf16.mxu0 %v4588_v4 }
 0x974   : > { %v1374_v52 = vpop.f32.mrf.mxu1  ;;  %v1417_v53 = vpop.f32.mrf.mxu0 }
 0x975   : > { %v4938_v54 = vadd.f32 %v1374_v52, %v1163_v48  ;;  %v4940_v55 = vadd.f32 %v1417_v53, %v1171_v49 }
 0x976   : > { %v1376_v56 = vpop.f32.mrf.mxu1  ;;  %v1419_v57 = vpop.f32.mrf.mxu0 }
 0x977   : > { %v1426_v58 = vmul.f32 %v4938_v54, %v4938_v54  ;;  %v1428_v59 = vmul.f32 %v4940_v55, %v4940_v55  ;;  %v4946_v60 = vadd.f32 %v1376_v56, %v1167_v50  ;;  %v4948_v61 = vadd.f32 %v1419_v57, %v1175_v51 }
 0x978   : > { %v1378_v62 = vpop.f32.mrf.mxu1  ;;  %v1421_v63 = vpop.f32.mrf.mxu0 }
 0x979   : > { %v1434_v0 = vmul.f32 %v1426_v58, %v4938_v54  ;;  %v1436_v1 = vmul.f32 %v1428_v59, %v4940_v55  ;;  %v1427_v2 = vmul.f32 %v4946_v60, %v4946_v60  ;;  %v1429_v3 = vmul.f32 %v4948_v61, %v4948_v61 }
 0x97a   : > { %v4956_v5 = vadd.f32 %v1378_v62, %v1163_v48  ;;  %v4958_v6 = vadd.f32 %v1421_v63, %v1171_v49  ;;  %v1380_v7 = vpop.f32.mrf.mxu1  ;;  %v1423_v8 = vpop.f32.mrf.mxu0 }
 0x97b   : > { %v1442_v9 = vmul.f32 0.044715, %v1434_v0  ;;  %v1444_v10 = vmul.f32 0.044715, %v1436_v1  ;;  %v1435_v11 = vmul.f32 %v1427_v2, %v4946_v60  ;;  %v1437_v12 = vmul.f32 %v1429_v3, %v4948_v61 }
 0x97c   : > { %v1430_v13 = vmul.f32 %v4956_v5, %v4956_v5  ;;  %v1432_v14 = vmul.f32 %v4958_v6, %v4958_v6  ;;  %v4966_v15 = vadd.f32 %v1380_v7, %v1167_v50  ;;  %v4968_v16 = vadd.f32 %v1423_v8, %v1175_v51 }
 0x97d   : > { %v1450_v17 = vadd.f32 %v1442_v9, %v4938_v54  ;;  %v1452_v19 = vadd.f32 %v1444_v10, %v4940_v55  ;;  %v1443_v20 = vmul.f32 0.044715, %v1435_v11  ;;  %v1445_v21 = vmul.f32 0.044715, %v1437_v12 }
 0x97e   : > { %v1438_v22 = vmul.f32 %v1430_v13, %v4956_v5  ;;  %v1440_v23 = vmul.f32 %v1432_v14, %v4958_v6  ;;  %v1431_v25 = vmul.f32 %v4966_v15, %v4966_v15  ;;  %v1433_v27 = vmul.f32 %v4968_v16, %v4968_v16 }
 0x97f   : > { %v1458_v28 = vmul.f32 0.7978846, %v1450_v17  ;;  %v1460_v29 = vmul.f32 0.7978846, %v1452_v19  ;;  %v1451_v30 = vadd.f32 %v1443_v20, %v4946_v60  ;;  %v1453_v31 = vadd.f32 %v1445_v21, %v4948_v61 }
 0x980   : > { %v1446_v32 = vmul.f32 0.044715, %v1438_v22  ;;  %v1448_v33 = vmul.f32 0.044715, %v1440_v23  ;;  %v1439_v34 = vmul.f32 %v1431_v25, %v4966_v15  ;;  %v1441_v35 = vmul.f32 %v1433_v27, %v4968_v16 }
 0x981   : > { %4290 = vtanh.f32 %v1458_v28  ;;  %v1459_v36 = vmul.f32 0.7978846, %v1451_v30  ;;  %v1461_v37 = vmul.f32 0.7978846, %v1453_v31 }
 0x982   : > { %4292 = vtanh.f32 %v1460_v29  ;;  %v1454_v38 = vadd.f32 %v1446_v32, %v4956_v5  ;;  %v1456_v39 = vadd.f32 %v1448_v33, %v4958_v6  ;;  %v1447_v40 = vmul.f32 0.044715, %v1439_v34 }
 0x983   : > { %4294 = vtanh.f32 %v1459_v36  ;;  %v1449_v41 = vmul.f32 0.044715, %v1441_v35 }
 0x984   : > { %4296 = vtanh.f32 %v1461_v37  ;;  %v1462_v45 = vmul.f32 0.7978846, %v1454_v38  ;;  %v1464_v48 = vmul.f32 0.7978846, %v1456_v39  ;;  %v1455_v49 = vadd.f32 %v1447_v40, %v4966_v15 }
 0x985   : > { %v1457_v50 = vadd.f32 %v1449_v41, %v4968_v16 }
 0x986   : > { %4298 = vtanh.f32 %v1462_v45  ;;  %v1463_v51 = vmul.f32 0.7978846, %v1455_v49  ;;  %v3521_v49 = vld [vmem:[%s5221_s9] ss:$0 sm:$0xff] }
 0x987   : > { %4300 = vtanh.f32 %v1464_v48  ;;  %v1465_v52 = vmul.f32 0.7978846, %v1457_v50 }
 0x988   : > { %4302 = vtanh.f32 %v1463_v51 }
 0x989   : > { %4304 = vtanh.f32 %v1465_v52 }
 0x98e   : > { %v4291_v53 = vpop.eup %4290 }
 0x98f   : > { %v4293_v56 = vpop.eup %4292  ;;  %v1474_v63 = vadd.f32 1.0, %v4291_v53 }
 0x990   : > { %v4295_v57 = vpop.eup %4294  ;;  %v1476_v2 = vadd.f32 1.0, %v4293_v56 }
 0x991   : > { %v4297_v58 = vpop.eup %4296  ;;  %v1475_v59 = vadd.f32 1.0, %v4295_v57  ;;  %v1482_v13 = vmul.f32 0.5, %v1474_v63  ;;  %v4150_v63 = vld [vmem:[#allocation7 + $0x150] ss:$12 sps:$4 sm:$0xff]  }
 0x992   : > { %v1477_v0 = vadd.f32 1.0, %v4297_v58  ;;  %v1484_v20 = vmul.f32 0.5, %v1476_v2  ;;  %v4160_v2 = vld [vmem:[#allocation7 + $0x124] ss:$12 sps:$4 sm:$0xff]  }
 0x993   : > { %v4299_v62 = vpop.eup %4298  ;;  %v1483_v12 = vmul.f32 0.5, %v1475_v59  ;;  %v1490_v29 = vmul.f32 %v1482_v13, %v4938_v54  ;;  %v4146_v54 = vld [vmem:[#allocation7 + $0x168] ss:$12 sps:$4 sm:$0xff]   ;;  %v4169_v13 = vld [vmem:[#allocation7 + $0xf8] ss:$12 sps:$4 sm:$0xff]  }
 0x994   : > { %v4301_v1 = vpop.eup %4300  ;;  %v1478_v3 = vadd.f32 1.0, %v4299_v62  ;;  %v1485_v19 = vmul.f32 0.5, %v1477_v0  ;;  %v1492_v32 = vmul.f32 %v1484_v20, %v4940_v55  ;;  %v4152_v62 = vld [vmem:[#allocation7 + $0x154] ss:$12 sps:$4 sm:$0xff]   ;;  %v4153_v0 = vld [vmem:[#allocation7 + $0x158] ss:$12 sps:$4 sm:$0xff]  }
 0x995   : > { %v4303_v7 = vpop.eup %4302  ;;  %v1480_v8 = vadd.f32 1.0, %v4301_v1  ;;  %v1491_v27 = vmul.f32 %v1483_v12, %v4946_v60  ;;  %v4148_v60 = vld [vmem:[#allocation7 + $0x16c] ss:$12 sps:$4 sm:$0xff]   ;;  %v4166_v12 = vld [vmem:[#allocation7 + $0xf0] ss:$12 sps:$4 sm:$0xff]  }
 0x996   : > { %v4305_v9 = vpop.eup %4304  ;;  %v1486_v10 = vmul.f32 0.5, %v1478_v3  ;;  %v1479_v11 = vadd.f32 1.0, %v4303_v7  ;;  %v1493_v30 = vmul.f32 %v1485_v19, %v4948_v61  ;;  %v4149_v61 = vld [vmem:[#allocation7 + $0x170] ss:$12 sps:$4 sm:$0xff]   ;;  %2031 = vmatprep.subr.bf16.mxu1 %v4148_v60  ;;  %v4157_v1 = vld [vmem:[#allocation7 + $0x140] ss:$12 sps:$4 sm:$0xff]  }
 0x997   : > { %v1488_v14 = vmul.f32 0.5, %v1480_v8  ;;  %v1481_v17 = vadd.f32 1.0, %v4305_v9  ;;  %v4158_v3 = vld [vmem:[#allocation7 + $0x120] ss:$12 sps:$4 sm:$0xff]   ;;  %v4161_v7 = vld [vmem:[#allocation7 + $0x128] ss:$12 sps:$4 sm:$0xff]  }
 0x998   : > { %v1487_v21 = vmul.f32 0.5, %v1479_v11  ;;  %v1494_v22 = vmul.f32 %v1486_v10, %v4956_v5  ;;  %v4164_v8 = vld [vmem:[#allocation7 + $0x10c] ss:$12 sps:$4 sm:$0xff]   ;;  %v4162_v9 = vld [vmem:[#allocation7 + $0x108] ss:$12 sps:$4 sm:$0xff]  }
 0x999   : > { %v1489_v23 = vmul.f32 0.5, %v1481_v17  ;;  %v1496_v25 = vmul.f32 %v1488_v14, %v4958_v6  ;;  %v4165_v10 = vld [vmem:[#allocation7 + $0x110] ss:$12 sps:$4 sm:$0xff]   ;;  %v4168_v11 = vld [vmem:[#allocation7 + $0xf4] ss:$12 sps:$4 sm:$0xff]  }
 0x99a   : > { %v1495_v28 = vmul.f32 %v1487_v21, %v4966_v15  ;;  %v1498_v35 = vpack.c.bf16 %v1494_v22, %v1490_v29  ;;  %v4172_v14 = vld [vmem:[#allocation7 + $0xdc] ss:$12 sps:$4 sm:$0xff]   ;;  %v4170_v17 = vld [vmem:[#allocation7 + $0xd8] ss:$12 sps:$4 sm:$0xff]   ;;  %v4173_v19 = vld [vmem:[#allocation7 + $0xe0] ss:$12 sps:$4 sm:$0xff]  }
 0x99b   : > { %v1497_v31 = vmul.f32 %v1489_v23, %v4968_v16  ;;  %v1500_v5 = vpack.c.bf16 %v1496_v25, %v1492_v32  ;;  %v4176_v20 = vld [vmem:[#allocation7 + $0xc4] ss:$12 sps:$4 sm:$0xff]   ;;  %v4174_v21 = vld [vmem:[#allocation7 + $0xc0] ss:$12 sps:$4 sm:$0xff]   ;;  %v4177_v22 = vld [vmem:[#allocation7 + $0xc8] ss:$12 sps:$4 sm:$0xff]   ;;  %v1864_v32 = vstv %s3522_s20 }
 0x99c   : > { %v1499_v33 = vpack.c.bf16 %v1495_v28, %v1491_v27 }
 0x99d   : > { %v1501_v34 = vpack.c.bf16 %v1497_v31, %v1493_v30 }
 0x99e   : > { %1790 = vmatprep.mubr.bf16.mxu1 %v1499_v33 }
 0x99f   : > { %1831 = vmatprep.mubr.bf16.mxu0 %v1501_v34  ;;  %1791 = vmatmul.mubr.bf16.vlgmr.msra.gmra.mxu1 %v1498_v35 }
 0x9a0   : > { %1832 = vmatmul.mubr.bf16.vlgmr.msra.gmra.mxu0 %v1500_v5  ;;  %2063 = vmatprep.mubr.bf16.mxu1 %v4589_v26 }
 0x9a1   : > { %3857 = vmatprep.mubr.msk.bf16.mxu0 %vm4590_vm0, %v4588_v4  ;;  %3842 = vmatpush3.bf16.msra.mxu0 %v4149_v61 }
 0x9a2   : > { %2032 = vmatpush1.bf16.msra.mxu1 %v4146_v54  ;;  %3843 = vmatprep.subr.bf16.mxu0 %v4588_v4 }
 0x9a3   : > { %2033 = vmatprep.subr.bf16.mxu1 %v4152_v62 }
 0x9a5   : > { %3844 = vmatpush3.bf16.msra.mxu0 %v4153_v0 }
 0x9a6   : > { %2034 = vmatpush1.bf16.msra.mxu1 %v4150_v63  ;;  %3845 = vmatprep.subr.bf16.mxu0 %v4588_v4 }
 0x9a9   : > { %3846 = vmatpush3.bf16.msra.mxu0 %v4157_v1 }
 0x9aa   : > { %3847 = vmatprep.subr.bf16.mxu0 %v4588_v4 }
 0x9ad   : > { %3848 = vmatpush3.bf16.msra.mxu0 %v4161_v7 }
 0x9ae   : > { %3849 = vmatprep.subr.bf16.mxu0 %v4588_v4 }
 0x9b1   : > { %3850 = vmatpush3.bf16.msra.mxu0 %v4165_v10 }
 0x9b2   : > { %3851 = vmatprep.subr.bf16.mxu0 %v4588_v4 }
 0x9b5   : > { %3852 = vmatpush3.bf16.msra.mxu0 %v4169_v13 }
 0x9b6   : > { %3853 = vmatprep.subr.bf16.mxu0 %v4588_v4 }
 0x9b9   : > { %3854 = vmatpush3.bf16.msra.mxu0 %v4173_v19 }
 0x9ba   : > { %3855 = vmatprep.subr.bf16.mxu0 %v4588_v4 }
 0x9bd   : > { %3856 = vmatpush3.bf16.msra.mxu0 %v4177_v22 }
 0x9be   : > { %3885 = vmatprep.subr.bf16.mxu0 %v4588_v4 }
 0xa5f   : > { %v3679_v55 = vpop.f32.mrf.mxu1 }
 0xa60   : > { %v3701_v6 = vpop.f32.mrf.mxu0 }
 0xa61   : > { %v3680_v15 = vpop.f32.mrf.mxu1 }
 0xa62   : > { %v3681_v16 = vadd.f32 %v3680_v15, %v3679_v55  ;;  %v3702_v36 = vpop.f32.mrf.mxu0 }
 0xa63   : > { %v3703_v37 = vadd.f32 %v3702_v36, %v3701_v6  ;;  %v3682_v38 = vpop.f32.mrf.mxu1 }
 0xa64   : > { %v3704_v39 = vpop.f32.mrf.mxu0 }
 0xa65   : > { %v1834_v40 = vadd.f32 %v3703_v37, %v3681_v16  ;;  %v3683_v41 = vpop.f32.mrf.mxu1 }
 0xa66   : > { %v3684_v45 = vadd.f32 %v3683_v41, %v3682_v38  ;;  %v3705_v48 = vpop.f32.mrf.mxu0 }
 0xa67   : > { %v1840_v50 = vadd.f32 %v1834_v40, %v4909_v18  ;;  %v3706_v51 = vadd.f32 %v3705_v48, %v3704_v39  ;;  %v4156_v18 = vld [vmem:[#allocation7 + $0x13c] ss:$12 sps:$4 sm:$0xff]  }
 0xa68   : > { %2035 = vmatprep.subr.bf16.mxu1 %v4156_v18 }
 0xa69   : > { %v1837_v52 = vadd.f32 %v3706_v51, %v3684_v45  ;;  %v5002_v53 = vadd.f32 %v3521_v49, %v1840_v50 }
 0xa6b   : > { %v1841_v56 = vadd.f32 %v1837_v52, %v4914_v24  ;;  %v1852_v57 = vmul.f32 %v5002_v53, %v5002_v53  ;;  %v4154_v24 = vld [vmem:[#allocation7 + $0x138] ss:$12 sps:$4 sm:$0xff]  }
 0xa6c   : > { %2036 = vmatpush1.bf16.msra.mxu1 %v4154_v24 }
 0xa6d   : > { %1854 = vadd.xlane.f32.xlu0 %v1852_v57  ;;  %v5007_v58 = vadd.f32 %v3521_v49, %v1841_v56  ;;  %2037 = vmatprep.subr.bf16.mxu1 %v4160_v2  ;;  %v4352_v49 = vld [vmem:[%s4863_s24] ss:$0 sm:$0xff] }
 0xa6f   : > { %v1853_v59 = vmul.f32 %v5007_v58, %v5007_v58 }
 0xa70   : > { %2038 = vmatpush1.bf16.msra.mxu1 %v4158_v3 }
 0xa71   : > { %1856 = vadd.xlane.f32.xlu1 %v1853_v59  ;;  %2039 = vmatprep.subr.bf16.mxu1 %v4164_v8 }
 0xa74   : > { %2040 = vmatpush1.bf16.msra.mxu1 %v4162_v9 }
 0xa75   : > { %2041 = vmatprep.subr.bf16.mxu1 %v4168_v11 }
 0xa78   : > { %2042 = vmatpush1.bf16.msra.mxu1 %v4166_v12 }
 0xa79   : > { %2043 = vmatprep.subr.bf16.mxu1 %v4172_v14 }
 0xa7c   : > { %2044 = vmatpush1.bf16.msra.mxu1 %v4170_v17 }
 0xa7d   : > { %2045 = vmatprep.subr.bf16.mxu1 %v4176_v20 }
 0xa80   : > { %2046 = vmatpush1.bf16.msra.mxu1 %v4174_v21 }
 0xa81   : > { %3861 = vmatprep.subr.bf16.mxu1 %v4588_v4 }
 0xaf6   : > { %v1855_v23 = vpop.xlane.xlu0 %1854 }
 0xaf7   : > { %v1858_v25 = vmul.f32 0.0078125, %v1855_v23 }
 0xaf9   : > { %v1860_v27 = vmax.f32 %v1858_v25, 1e-10 }
 0xafa   : > { %v1857_v28 = vpop.xlane.xlu1 %1856 }
 0xafb   : > { %4306 = vrsqrt.f32 %v1860_v27  ;;  %v1859_v29 = vmul.f32 0.0078125, %v1857_v28 }
 0xafd   : > { %v1861_v30 = vmax.f32 %v1859_v29, 1e-10 }
 0xaff   : > { %4308 = vrsqrt.f32 %v1861_v30 }
 0xb08   : > { %v4307_v31 = vpop.eup %4306 }
 0xb09   : > { %v1865_v33 = vmul.f32 %v4307_v31, %v1864_v32 }
 0xb0b   : > { %v1867_v5 = vmul.f32 %v1865_v33, %v5002_v53 }
 0xb0c   : > { %v4309_v34 = vpop.eup %4308 }
 0xb0d   : > { %v1866_v35 = vmul.f32 %v4309_v34, %v1864_v32 }
 0xb0f   : > { %v1868_v54 = vmul.f32 %v1866_v35, %v5007_v58 }
 0xb11   : > { %v1869_v60 = vpack.c.bf16 %v1868_v54, %v1867_v5 }
 0xb13   : > { %2064 = vmatmul.mubr.bf16.vlgmr.msra.gmra.mxu1 %v1869_v60  ;;  %3858 = vmatmul.mubr.bf16.vlgmr.msra.gmra.mxu0 %v1869_v60 }
 0xb14   : > { %3863 = vmatprep.mubr.msk.bf16.mxu1 %vm4590_vm0, %v4588_v4  ;;  %3901 = vmatprep.mubr.msk.bf16.mxu0 %vm4590_vm0, %v4588_v4 }
 0xbd3   : > { %v2065_v61 = vpop.f32.mrf.mxu1  ;;  %v2108_v55 = vpop.f32.mrf.mxu0 }
 0xbd5   : > { %v2067_v6 = vpop.f32.mrf.mxu1  ;;  %v3859_v15 = vpop.f32.mrf.mxu0 }
 0xbd7   : > { %v2069_v16 = vpop.f32.mrf.mxu1  ;;  %v2111_v36 = vpop.f32.mrf.mxu0 }
 0xbd8   : > { %v2115_v41 = vpack.c.bf16 %v2069_v16, %v2065_v61  ;;  %v5027_v45 = vpack.c.bf16 %v2111_v36, %v2108_v55 }
 0xbd9   : > { %v2071_v37 = vpop.f32.mrf.mxu1  ;;  %v3860_v38 = vpop.f32.mrf.mxu0 }
 0xbda   : > { %v2116_v39 = vpack.c.bf16 %v2071_v37, %v2067_v6 }
 0xbdc   : > { %v2122_v40 = vsel %vm740_vm1, %v2116_v39, 0 }
 0xbdd   : > { %3862 = vmatpush3.bf16.xpose.msra.mxu1 %v2122_v40 }
 0xbde   : > { %3867 = vmatprep.subr.bf16.mxu1 %v4588_v4 }
 0xbe4   : > { %3864 = vmatmul.mubr.msk.bf16.vlgmr.msra.gmra.mxu1 %vm740_vm1, %v2115_v41 }
 0xbe5   : > { %3868 = vmatpush3.bf16.msra.mxu1 %v5027_v45  ;;  %3869 = vmatprep.mubr.msk.bf16.mxu1 %vm4590_vm0, %v4588_v4 }
 0xbe6   : > { %3873 = vmatprep.subr.bf16.mxu1 %v4588_v4 }
 0xca4   : > { %v2158_v48 = vpop.f32.mrf.mxu1 }
 0xca5   : > { %v2159_v50 = vadd.f32 %v4352_v49, %v2158_v48 }
 0xca6   : > { %v3865_v51 = vpop.f32.mrf.mxu1 }
 0xca7   : > { %v2165_v52 = vsel %vm788_vm2, %v2159_v50, -inf }
 0xca8   : > { %2166 = vmax.xlane.f32.xlu0 %v2165_v52  ;;  %v2161_v56 = vpop.f32.mrf.mxu1 }
 0xca9   : > { %v2162_v57 = vadd.f32 %v4352_v49, %v2161_v56  ;;  %v4178_v56 = vld [vmem:[#allocation9 + $0x78] sm:$0xff]  }
 0xcaa   : > { %v3866_v59 = vpop.f32.mrf.mxu1  ;;  %3886 = vmatpush3.bf16.msra.mxu0 %v4178_v56  ;;  %v4233_v56 = vld [vmem:[#allocation10 + $0x10c] ss:$16 sps:$4 sm:$0xff]  }
 0xcab   : > { %v2168_v62 = vsel %vm788_vm2, %v2162_v57, -inf  ;;  %3887 = vmatprep.subr.bf16.mxu0 %v4588_v4  ;;  %v4181_v59 = vld [vmem:[#allocation9 + $0x60] sm:$0xff]  }
 0xcac   : > { %2169 = vmax.xlane.f32.xlu1 %v2168_v62  ;;  %v4182_v62 = vld [vmem:[#allocation9 + $0x58] sm:$0xff]  }
 0xd31   : > { %v2167_v63 = vpop.xlane.xlu0 %2166 }
 0xd32   : > { %v2171_v0 = vsub.f32 %v2159_v50, %v2167_v63  ;;  %v4183_v63 = vld [vmem:[#allocation9 + $0x50] sm:$0xff]  }
 0xd34   : > { %v2173_v18 = vmul.f32 1.442695, %v2171_v0  ;;  %v4184_v0 = vld [vmem:[#allocation9 + $0x48] sm:$0xff]  }
 0xd35   : > { %v2170_v24 = vpop.xlane.xlu1 %2169 }
 0xd36   : > { %4310 = vpow2.f32 %v2173_v18  ;;  %v2172_v1 = vsub.f32 %v2162_v57, %v2170_v24  ;;  %v4179_v57 = vld [vmem:[#allocation9 + $0x70] sm:$0xff]   ;;  %v4185_v18 = vld [vmem:[#allocation9 + $0x40] sm:$0xff]  }
 0xd37   : > { %3888 = vmatpush3.bf16.msra.mxu0 %v4179_v57  ;;  %v4228_v57 = vld [vmem:[#allocation10 + $0x100] ss:$16 sps:$4 sm:$0xff]  }
 0xd38   : > { %v2175_v2 = vmul.f32 1.442695, %v2172_v1  ;;  %3889 = vmatprep.subr.bf16.mxu0 %v4588_v4 }
 0xd3a   : > { %4312 = vpow2.f32 %v2175_v2 }
 0xd43   : > { %v4311_v3 = vpop.eup %4310 }
 0xd44   : > { %v2177_v7 = vsel %vm788_vm2, %v4311_v3, 0.0 }
 0xd45   : > { %2178 = vadd.xlane.f32.xlu0 %v2177_v7 }
 0xd47   : > { %v4313_v8 = vpop.eup %4312 }
 0xd48   : > { %v2180_v9 = vsel %vm788_vm2, %v4313_v8, 0.0 }
 0xd49   : > { %2181 = vadd.xlane.f32.xlu1 %v2180_v9 }
 0xd5a   : > { %2233 = vrot.lane.b32.xlu1 %v2115_v41, %s4591_s18 }
 0xd5b   : > { %2236 = vrot.lane.b32.xlu0 %v2116_v39, %s4591_s18 }
 0xdce   : > { %v2179_v10 = vpop.xlane.xlu0 %2178 }
 0xdcf   : > { %4314 = vrcp.f32 %v2179_v10 }
 0xdd2   : > { %v2182_v11 = vpop.xlane.xlu1 %2181  ;;  %v2237_v19 = vpop.permute.xlu0 %2236 }
 0xdd3   : > { %4316 = vrcp.f32 %v2182_v11  ;;  %v2242_v21 = vsel %vm740_vm1, %v2237_v19, 0  ;;  %v4191_v19 = vld [vmem:[#allocation10 + $0x1ec] ss:$16 sps:$4 sm:$0xff]  }
 0xdd6   : > { %v2234_v22 = vpop.permute.xlu1 %2233 }
 0xddc   : > { %v4315_v12 = vpop.eup %4314 }
 0xddd   : > { %v2185_v14 = vmul.f32 %v4315_v12, %v4311_v3 }
 0xde0   : > { %v4317_v13 = vpop.eup %4316 }
 0xde1   : > { %v2186_v17 = vmul.f32 %v4317_v13, %v4313_v8 }
 0xde3   : > { %v2187_v20 = vpack.c.bf16 %v2186_v17, %v2185_v14  ;;  %v4188_v14 = vld [vmem:[#allocation10 + $0x1e4] ss:$16 sps:$4 sm:$0xff]   ;;  %v4189_v17 = vld [vmem:[#allocation10 + $0x1e8] ss:$16 sps:$4 sm:$0xff]  }
 0xde5   : > { %3870 = vmatmul.mubr.msk.bf16.vlgmr.msra.gmra.mxu1 %vm788_vm2, %v2187_v20 }
 0xde6   : > { %3874 = vmatpush3.bf16.xpose.msra.mxu1 %v2242_v21  ;;  %3875 = vmatprep.mubr.msk.bf16.mxu1 %vm4590_vm0, %v4588_v4  ;;  %v3560_v21 = vld [vmem:[%s5217_s5 + $0x1] ss:$0 sm:$0xff] }
 0xde7   : > { %3879 = vmatprep.subr.bf16.mxu1 %v4588_v4 }
 0xded   : > { %3876 = vmatmul.mubr.msk.bf16.vlgmr.msra.gmra.mxu1 %vm740_vm1, %v2234_v22 }
 0xdee   : > { %3881 = vmatprep.mubr.msk.bf16.mxu1 %vm4590_vm0, %v4588_v4 }
 0xea5   : > { %v5049_v23 = vpop.f32.mrf.mxu1 }
 0xea7   : > { %v3871_v25 = vpop.f32.mrf.mxu1 }
 0xea9   : > { %v5051_v27 = vpop.f32.mrf.mxu1 }
 0xeab   : > { %v3872_v28 = vpop.f32.mrf.mxu1 }
 0xead   : > { %v2278_v29 = vpop.f32.mrf.mxu1 }
 0xeae   : > { %v2279_v30 = vadd.f32 %v4352_v49, %v2278_v29 }
 0xeaf   : > { %v3877_v31 = vpop.f32.mrf.mxu1 }
 0xeb0   : > { %v2285_v32 = vsel %vm788_vm2, %v2279_v30, -inf }
 0xeb1   : > { %2286 = vmax.xlane.f32.xlu1 %v2285_v32  ;;  %v2281_v33 = vpop.f32.mrf.mxu1  ;;  %v4194_v32 = vld [vmem:[#allocation10 + $0x1c4] ss:$16 sps:$4 sm:$0xff]  }
 0xeb2   : > { %v2282_v34 = vadd.f32 %v4352_v49, %v2281_v33  ;;  %v4197_v33 = vld [vmem:[#allocation10 + $0x1cc] ss:$16 sps:$4 sm:$0xff]  }
 0xeb3   : > { %v3878_v35 = vpop.f32.mrf.mxu1 }
 0xeb4   : > { %v2288_v5 = vsel %vm788_vm2, %v2282_v34, -inf  ;;  %v4203_v35 = vld [vmem:[#allocation10 + $0x1ac] ss:$16 sps:$4 sm:$0xff]  }
 0xeb5   : > { %2289 = vmax.xlane.f32.xlu0 %v2288_v5  ;;  %v4198_v5 = vld [vmem:[#allocation10 + $0x1a0] ss:$16 sps:$4 sm:$0xff]  }
 0xf3a   : > { %v2287_v54 = vpop.xlane.xlu1 %2286 }
 0xf3b   : > { %v2291_v60 = vsub.f32 %v2279_v30, %v2287_v54  ;;  %v4201_v54 = vld [vmem:[#allocation10 + $0x1a8] ss:$16 sps:$4 sm:$0xff]  }
 0xf3d   : > { %v2293_v61 = vmul.f32 1.442695, %v2291_v60  ;;  %v4206_v60 = vld [vmem:[#allocation10 + $0x184] ss:$16 sps:$4 sm:$0xff]  }
 0xf3e   : > { %v2290_v55 = vpop.xlane.xlu0 %2289 }
 0xf3f   : > { %4318 = vpow2.f32 %v2293_v61  ;;  %v2292_v6 = vsub.f32 %v2282_v34, %v2290_v55  ;;  %v4195_v34 = vld [vmem:[#allocation10 + $0x1c8] ss:$16 sps:$4 sm:$0xff]   ;;  %v4209_v61 = vld [vmem:[#allocation10 + $0x18c] ss:$16 sps:$4 sm:$0xff]   ;;  %v4204_v55 = vld [vmem:[#allocation10 + $0x180] ss:$16 sps:$4 sm:$0xff]  }
 0xf41   : > { %v2295_v15 = vmul.f32 1.442695, %v2292_v6  ;;  %v4207_v6 = vld [vmem:[#allocation10 + $0x188] ss:$16 sps:$4 sm:$0xff]  }
 0xf43   : > { %4320 = vpow2.f32 %v2295_v15  ;;  %v4212_v15 = vld [vmem:[#allocation10 + $0x164] ss:$16 sps:$4 sm:$0xff]  }
 0xf4c   : > { %v4319_v16 = vpop.eup %4318 }
 0xf4d   : > { %v2297_v36 = vsel %vm788_vm2, %v4319_v16, 0.0 }
 0xf4e   : > { %2298 = vadd.xlane.f32.xlu0 %v2297_v36  ;;  %v4210_v36 = vld [vmem:[#allocation10 + $0x160] ss:$16 sps:$4 sm:$0xff]  }
 0xf50   : > { %v4321_v37 = vpop.eup %4320 }
 0xf51   : > { %v2300_v38 = vsel %vm788_vm2, %v4321_v37, 0.0 }
 0xf52   : > { %2301 = vadd.xlane.f32.xlu1 %v2300_v38  ;;  %v4218_v38 = vld [vmem:[#allocation10 + $0x144] ss:$16 sps:$4 sm:$0xff]  }
 0xf64   : > { %2309 = vrot.lane.b32.xlu0 %v5027_v45, %s4591_s18  ;;  %v4180_v45 = vld [vmem:[#allocation9 + $0x68] sm:$0xff]  }
 0xf65   : > { %3890 = vmatpush3.bf16.msra.mxu0 %v4180_v45  ;;  %v4231_v45 = vld [vmem:[#allocation10 + $0x108] ss:$16 sps:$4 sm:$0xff]  }
 0xf66   : > { %3891 = vmatprep.subr.bf16.mxu0 %v4588_v4 }
 0xf69   : > { %3892 = vmatpush3.bf16.msra.mxu0 %v4181_v59 }
 0xf6a   : > { %3893 = vmatprep.subr.bf16.mxu0 %v4588_v4 }
 0xf6d   : > { %3894 = vmatpush3.bf16.msra.mxu0 %v4182_v62 }
 0xf6e   : > { %3895 = vmatprep.subr.bf16.mxu0 %v4588_v4 }
 0xf71   : > { %3896 = vmatpush3.bf16.msra.mxu0 %v4183_v63 }
 0xf72   : > { %3897 = vmatprep.subr.bf16.mxu0 %v4588_v4 }
 0xf75   : > { %3898 = vmatpush3.bf16.msra.mxu0 %v4184_v0 }
 0xf76   : > { %3899 = vmatprep.subr.bf16.mxu0 %v4588_v4  ;;  %v4186_v4 = vld [vmem:[#allocation10 + $0x1e0] ss:$16 sps:$4 sm:$0xff]  }
 0xf79   : > { %3900 = vmatpush3.bf16.msra.mxu0 %v4185_v18 }
 0xf7a   : > { %2763 = vmatprep.subr.bf16.mxu0 %v4191_v19  ;;  %v4239_v19 = vld [vmem:[#allocation12 + $0x1f0] sm:$0xff]  }
 0xfd7   : > { %v2299_v39 = vpop.xlane.xlu0 %2298 }
 0xfd8   : > { %4322 = vrcp.f32 %v2299_v39  ;;  %v4221_v39 = vld [vmem:[#allocation10 + $0x14c] ss:$16 sps:$4 sm:$0xff]  }
 0xfdb   : > { %v2302_v40 = vpop.xlane.xlu1 %2301  ;;  %v2310_v41 = vpop.permute.xlu0 %2309 }
 0xfdc   : > { %4324 = vrcp.f32 %v2302_v40  ;;  %3880 = vmatpush3.bf16.msra.mxu1 %v2310_v41  ;;  %v4216_v40 = vld [vmem:[#allocation10 + $0x140] ss:$16 sps:$4 sm:$0xff]   ;;  %v4219_v41 = vld [vmem:[#allocation10 + $0x148] ss:$16 sps:$4 sm:$0xff]  }
 0xfdd   : > { %2720 = vmatprep.subr.bf16.mxu1 %v4188_v14  ;;  %v4237_v14 = vld [vmem:[#allocation12 + $0x1b8] sm:$0xff]  }
 0xfe5   : > { %v4323_v48 = vpop.eup %4322 }
 0xfe6   : > { %v2305_v50 = vmul.f32 %v4323_v48, %v4319_v16  ;;  %v4215_v16 = vld [vmem:[#allocation10 + $0x16c] ss:$16 sps:$4 sm:$0xff]   ;;  %v4224_v48 = vld [vmem:[#allocation10 + $0x124] ss:$16 sps:$4 sm:$0xff]  }
 0xfe9   : > { %v4325_v49 = vpop.eup %4324 }
 0xfea   : > { %v2306_v51 = vmul.f32 %v4325_v49, %v4321_v37  ;;  %v4213_v37 = vld [vmem:[#allocation10 + $0x168] ss:$16 sps:$4 sm:$0xff]   ;;  %v4227_v49 = vld [vmem:[#allocation10 + $0x12c] ss:$16 sps:$4 sm:$0xff]  }
 0xfec   : > { %v2307_v52 = vpack.c.bf16 %v2306_v51, %v2305_v50  ;;  %v4222_v50 = vld [vmem:[#allocation10 + $0x120] ss:$16 sps:$4 sm:$0xff]   ;;  %v4225_v51 = vld [vmem:[#allocation10 + $0x128] ss:$16 sps:$4 sm:$0xff]  }
 0xfee   : > { %3882 = vmatmul.mubr.msk.bf16.vlgmr.msra.gmra.mxu1 %vm788_vm2, %v2307_v52  ;;  %v4230_v52 = vld [vmem:[#allocation10 + $0x104] ss:$16 sps:$4 sm:$0xff]  }
 0xfef   : > { %2752 = vmatprep.mubr.bf16.mxu1 %v4589_v26  ;;  %2721 = vmatpush1.bf16.msra.mxu1 %v4186_v4  ;;  %v4236_v4 = vld [vmem:[#allocation12 + $0x138] sm:$0xff]  }
 0xff0   : > { %2722 = vmatprep.subr.bf16.mxu1 %v4194_v32  ;;  %v4249_v32 = vld [vmem:[#allocation12 + $0x1a0] sm:$0xff]  }
0x10ae   : > { %v2349_v24 = vpop.f32.mrf.mxu1 }
0x10b0   : > { %v3883_v1 = vpop.f32.mrf.mxu1 }
0x10b2   : > { %v2352_v2 = vpop.f32.mrf.mxu1 }
0x10b3   : > { %v4021_v3 = vpack.i.bf16 %v2352_v2, %v2349_v24  ;;  %v2498_v2 = vstv %s3561_s26  ;;  %s4500_s26 = sshll.u32 %s4592_s6, 4  ;;  %s4501_s26 = int_to_ptr.vmem [resolvable:$false] %s4500_s26 }
0x10b4   : > { %v3884_v7 = vpop.f32.mrf.mxu1  ;;  %s4502_s24 = scalar_lea.vmem %s4501_s26, 512  ;;  %p4503_p5 = scmp.lt.s32.totalorder %s5169_s11, %s4501_s26 }
0x10b5   : > { %4022 = vrot.lane.b32.xlu1 %v4021_v3, %s4591_s18  ;;  %p4504_p1 = scmp.lt.s32.totalorder %s4502_s24, %s4496_s19 }
0x10b7   : > { %p4505_p13 = por %p4504_p1, %p4503_p5 }
0x10b9   : > { %p4506_p2 = pnand %p4505_p13, %p4499_p7 }
0x1127   : > { %v4023_v8 = vpop.permute.xlu1 %4022 }
0x1128   : > { %v4025_v9 = vunpack.i.h.bf16 %v4023_v8  ;;  %v4024_v10 = vunpack.i.l.bf16 %v4023_v8 }
0x112a   : > { %v2365_v11 = vsel %vm740_vm1, %v5051_v27, %v4025_v9  ;;  %v2364_v12 = vsel %vm740_vm1, %v5049_v23, %v4024_v10 }
0x112b   : > { %v2366_v13 = vpack.c.bf16 %v2365_v11, %v2364_v12  ;;  %v4234_v12 = vld [vmem:[#allocation12 + $0x178] sm:$0xff]  }
0x112d   : > { %3902 = vmatmul.mubr.bf16.vlgmr.msra.gmra.mxu0 %v2366_v13  ;;  %v4235_v13 = vld [vmem:[#allocation12 + $0x1f8] sm:$0xff]  }
0x112e   : > { %2795 = vmatprep.mubr.bf16.mxu0 %v4589_v26  ;;  %2764 = vmatpush1.bf16.msra.mxu0 %v4189_v17  ;;  %v4238_v17 = vld [vmem:[#allocation12 + $0x170] sm:$0xff]  }
0x112f   : > { %2765 = vmatprep.subr.bf16.mxu0 %v4197_v33  ;;  %v4250_v33 = vld [vmem:[#allocation12 + $0x158] sm:$0xff]  }
0x1132   : > { %2766 = vmatpush1.bf16.msra.mxu0 %v4195_v34  ;;  %v4252_v34 = vld [vmem:[#allocation12 + $0x118] sm:$0xff]  }
0x1133   : > { %2767 = vmatprep.subr.bf16.mxu0 %v4203_v35  ;;  %v4254_v35 = vld [vmem:[#allocation12 + $0x150] sm:$0xff]  }
0x1136   : > { %2768 = vmatpush1.bf16.msra.mxu0 %v4201_v54  ;;  %v4256_v54 = vld [vmem:[#allocation12 + $0x110] sm:$0xff]  }
0x1137   : > { %2769 = vmatprep.subr.bf16.mxu0 %v4209_v61  ;;  %v4258_v61 = vld [vmem:[#allocation12 + $0x148] sm:$0xff]  }
0x113a   : > { %2770 = vmatpush1.bf16.msra.mxu0 %v4207_v6  ;;  %v4260_v6 = vld [vmem:[#allocation12 + $0x108] sm:$0xff]  }
0x113b   : > { %2771 = vmatprep.subr.bf16.mxu0 %v4215_v16  ;;  %v4262_v16 = vld [vmem:[#allocation12 + $0x140] sm:$0xff]  }
0x113e   : > { %2772 = vmatpush1.bf16.msra.mxu0 %v4213_v37  ;;  %v4264_v37 = vld [vmem:[#allocation12 + $0x100] sm:$0xff]  }
0x113f   : > { %2773 = vmatprep.subr.bf16.mxu0 %v4221_v39  ;;  %v3562_v39 = vld [vmem:[%s5219_s7 + $0x4] sm:$0xf] }
0x1142   : > { %2774 = vmatpush1.bf16.msra.mxu0 %v4219_v41  ;;  %v2551_v41 = vrot.slane %v3562_v39, %v1170_v44 }
0x1143   : > { %2775 = vmatprep.subr.bf16.mxu0 %v4227_v49  ;;  %v2555_v49 = vrot.slane %v3562_v39, %v1174_v47 }
0x1146   : > { %2776 = vmatpush1.bf16.msra.mxu0 %v4225_v51 }
0x1147   : > { %2777 = vmatprep.subr.bf16.mxu0 %v4233_v56 }
0x114a   : > { %2778 = vmatpush1.bf16.msra.mxu0 %v4231_v45 }
0x114b   : > { %3755 = vmatprep.subr.bf16.mxu0 %v4235_v13 }
0x11ed   : > { %v2466_v20 = vpop.f32.mrf.mxu0 }
0x11ee   : > { %v2473_v22 = vadd.f32 %v2466_v20, %v5002_v53  ;;  %v4192_v53 = vld [vmem:[#allocation10 + $0x1c0] ss:$16 sps:$4 sm:$0xff]  }
0x11ef   : > { %v3903_v23 = vpop.f32.mrf.mxu0  ;;  %2723 = vmatpush1.bf16.msra.mxu1 %v4192_v53  ;;  %v4240_v20 = vld [vmem:[#allocation12 + $0x130] sm:$0xff]   ;;  %v4251_v53 = vld [vmem:[#allocation12 + $0x1d8] sm:$0xff]  }
0x11f0   : > { %v5078_v25 = vadd.f32 %v3560_v21, %v2473_v22  ;;  %v4242_v22 = vld [vmem:[#allocation12 + $0x168] sm:$0xff]  }
0x11f1   : > { %v2469_v27 = vpop.f32.mrf.mxu0  ;;  %v4243_v23 = vld [vmem:[#allocation12 + $0x1e8] sm:$0xff]  }
0x11f2   : > { %v2474_v26 = vadd.f32 %v2469_v27, %v5007_v58  ;;  %v2486_v28 = vmul.f32 %v5078_v25, %v5078_v25  ;;  %v4200_v58 = vld [vmem:[#allocation10 + $0x1a4] ss:$16 sps:$4 sm:$0xff]   ;;  %v4244_v27 = vld [vmem:[#allocation12 + $0x128] sm:$0xff]  }
0x11f3   : > { %v3904_v29 = vpop.f32.mrf.mxu0  ;;  %2724 = vmatprep.subr.bf16.mxu1 %v4200_v58  ;;  %v4253_v58 = vld [vmem:[#allocation12 + $0x198] sm:$0xff]  }
0x11f4   : > { %v5083_v30 = vadd.f32 %v3560_v21, %v2474_v26  ;;  %2488 = vadd.xlane.f32.xlu1 %v2486_v28  ;;  %2725 = vmatpush1.bf16.msra.mxu1 %v4198_v5  ;;  %v4241_v21 = vld [vmem:[#allocation12 + $0x1b0] sm:$0xff]   ;;  %v4245_v26 = vld [vmem:[#allocation12 + $0x1a8] sm:$0xff]   ;;  %v4246_v28 = vld [vmem:[#allocation12 + $0x160] sm:$0xff]  }
0x11f5   : > { %2726 = vmatprep.subr.bf16.mxu1 %v4206_v60  ;;  %v4247_v29 = vld [vmem:[#allocation12 + $0x1e0] sm:$0xff]   ;;  %v4255_v5 = vld [vmem:[#allocation12 + $0x1d0] sm:$0xff]  }
0x11f6   : > { %v2487_v31 = vmul.f32 %v5083_v30, %v5083_v30  ;;  %v4257_v60 = vld [vmem:[#allocation12 + $0x190] sm:$0xff]  }
0x11f8   : > { %2490 = vadd.xlane.f32.xlu0 %v2487_v31  ;;  %2727 = vmatpush1.bf16.msra.mxu1 %v4204_v55  ;;  %v4248_v31 = vld [vmem:[#allocation12 + $0x120] sm:$0xff]   ;;  %v4259_v55 = vld [vmem:[#allocation12 + $0x1c8] sm:$0xff]  }
0x11f9   : > { %2728 = vmatprep.subr.bf16.mxu1 %v4212_v15  ;;  %v4261_v15 = vld [vmem:[#allocation12 + $0x188] sm:$0xff]  }
0x11fc   : > { %2729 = vmatpush1.bf16.msra.mxu1 %v4210_v36  ;;  %v4263_v36 = vld [vmem:[#allocation12 + $0x1c0] sm:$0xff]  }
0x11fd   : > { %2730 = vmatprep.subr.bf16.mxu1 %v4218_v38  ;;  %v4265_v38 = vld [vmem:[#allocation12 + $0x180] sm:$0xff]  }
0x1200   : > { %2731 = vmatpush1.bf16.msra.mxu1 %v4216_v40  ;;  %v2543_v40 = vrot.slane %v3562_v39, %v1162_v43 }
0x1201   : > { %2732 = vmatprep.subr.bf16.mxu1 %v4224_v48  ;;  %v2547_v48 = vrot.slane %v3562_v39, %v1166_v46 }
0x1204   : > { %2733 = vmatpush1.bf16.msra.mxu1 %v4222_v50 }
0x1205   : > { %2734 = vmatprep.subr.bf16.mxu1 %v4230_v52 }
0x1208   : > { %2735 = vmatpush1.bf16.msra.mxu1 %v4228_v57 }
0x1209   : > { %3733 = vmatprep.subr.bf16.mxu1 %v4234_v12 }
0x127d   : > { %v2489_v59 = vpop.xlane.xlu1 %2488 }
0x127e   : > { %v2492_v62 = vmul.f32 0.0078125, %v2489_v59 }
0x1280   : > { %v2494_v63 = vmax.f32 %v2492_v62, 1e-10 }
0x1281   : > { %v2491_v0 = vpop.xlane.xlu0 %2490 }
0x1282   : > { %4326 = vrsqrt.f32 %v2494_v63  ;;  %v2493_v18 = vmul.f32 0.0078125, %v2491_v0 }
0x1284   : > { %v2495_v24 = vmax.f32 %v2493_v18, 1e-10 }
0x1286   : > { %4328 = vrsqrt.f32 %v2495_v24 }
0x128f   : > { %v4327_v1 = vpop.eup %4326 }
0x1290   : > { %v2499_v3 = vmul.f32 %v4327_v1, %v2498_v2 }
0x1292   : > { %v2501_v9 = vmul.f32 %v2499_v3, %v5078_v25 }
0x1293   : > { %v4329_v7 = vpop.eup %4328 }
0x1294   : > { %v2500_v8 = vmul.f32 %v4329_v7, %v2498_v2 }
0x1296   : > { %v2502_v10 = vmul.f32 %v2500_v8, %v5083_v30 }
0x1298   : > { %v2503_v11 = vpack.c.bf16 %v2502_v10, %v2501_v9 }
0x129a   : > { %2753 = vmatmul.mubr.bf16.vlgmr.msra.gmra.mxu1 %v2503_v11  ;;  %2796 = vmatmul.mubr.bf16.vlgmr.msra.gmra.mxu0 %v2503_v11 }
0x129b   : > { %3734 = vmatpush3.bf16.msra.mxu1 %v4236_v4  ;;  %3756 = vmatpush3.bf16.msra.mxu0 %v4237_v14 }
0x129c   : > { %3735 = vmatprep.subr.bf16.mxu1 %v4238_v17  ;;  %3757 = vmatprep.subr.bf16.mxu0 %v4239_v19 }
0x129f   : > { %3736 = vmatpush3.bf16.msra.mxu1 %v4240_v20  ;;  %3758 = vmatpush3.bf16.msra.mxu0 %v4241_v21 }
0x12a0   : > { %3737 = vmatprep.subr.bf16.mxu1 %v4242_v22  ;;  %3759 = vmatprep.subr.bf16.mxu0 %v4243_v23 }
0x12a3   : > { %3738 = vmatpush3.bf16.msra.mxu1 %v4244_v27  ;;  %3760 = vmatpush3.bf16.msra.mxu0 %v4245_v26 }
0x12a4   : > { %3739 = vmatprep.subr.bf16.mxu1 %v4246_v28  ;;  %3761 = vmatprep.subr.bf16.mxu0 %v4247_v29 }
0x12a7   : > { %3740 = vmatpush3.bf16.msra.mxu1 %v4248_v31  ;;  %3762 = vmatpush3.bf16.msra.mxu0 %v4249_v32 }
0x12a8   : > { %3741 = vmatprep.subr.bf16.mxu1 %v4250_v33  ;;  %3763 = vmatprep.subr.bf16.mxu0 %v4251_v53 }
0x12ab   : > { %3742 = vmatpush3.bf16.msra.mxu1 %v4252_v34  ;;  %3764 = vmatpush3.bf16.msra.mxu0 %v4253_v58 }
0x12ac   : > { %3743 = vmatprep.subr.bf16.mxu1 %v4254_v35  ;;  %3765 = vmatprep.subr.bf16.mxu0 %v4255_v5 }
0x12af   : > { %3744 = vmatpush3.bf16.msra.mxu1 %v4256_v54  ;;  %3766 = vmatpush3.bf16.msra.mxu0 %v4257_v60 }
0x12b0   : > { %3745 = vmatprep.subr.bf16.mxu1 %v4258_v61  ;;  %3767 = vmatprep.subr.bf16.mxu0 %v4259_v55 }
0x12b3   : > { %3746 = vmatpush3.bf16.msra.mxu1 %v4260_v6  ;;  %3768 = vmatpush3.bf16.msra.mxu0 %v4261_v15 }
0x12b4   : > { %3747 = vmatprep.subr.bf16.mxu1 %v4262_v16  ;;  %3769 = vmatprep.subr.bf16.mxu0 %v4263_v36 }
0x12b7   : > { %3748 = vmatpush3.bf16.msra.mxu1 %v4264_v37  ;;  %3770 = vmatpush3.bf16.msra.mxu0 %v4265_v38 }
0x135a   : > { %v2754_v50 = vpop.f32.mrf.mxu1  ;;  %v2797_v51 = vpop.f32.mrf.mxu0 }
0x135b   : > { %v5100_v52 = vadd.f32 %v2754_v50, %v2543_v40  ;;  %v5102_v56 = vadd.f32 %v2797_v51, %v2551_v41 }
0x135c   : > { %v2756_v57 = vpop.f32.mrf.mxu1  ;;  %v2799_v45 = vpop.f32.mrf.mxu0 }
0x135d   : > { %v2806_v43 = vmul.f32 %v5100_v52, %v5100_v52  ;;  %v2808_v44 = vmul.f32 %v5102_v56, %v5102_v56  ;;  %v5108_v59 = vadd.f32 %v2756_v57, %v2547_v48  ;;  %v5110_v46 = vadd.f32 %v2799_v45, %v2555_v49 }
0x135e   : > { %v2758_v42 = vpop.f32.mrf.mxu1  ;;  %v2801_v47 = vpop.f32.mrf.mxu0 }
0x135f   : > { %v2814_v62 = vmul.f32 %v2806_v43, %v5100_v52  ;;  %v2816_v63 = vmul.f32 %v2808_v44, %v5102_v56  ;;  %v2807_v0 = vmul.f32 %v5108_v59, %v5108_v59  ;;  %v2809_v18 = vmul.f32 %v5110_v46, %v5110_v46 }
0x1360   : > { %v5118_v24 = vadd.f32 %v2758_v42, %v2543_v40  ;;  %v5120_v1 = vadd.f32 %v2801_v47, %v2551_v41  ;;  %v2760_v2 = vpop.f32.mrf.mxu1  ;;  %v2803_v3 = vpop.f32.mrf.mxu0 }
0x1361   : > { %v2822_v7 = vmul.f32 0.044715, %v2814_v62  ;;  %v2824_v8 = vmul.f32 0.044715, %v2816_v63  ;;  %v2815_v9 = vmul.f32 %v2807_v0, %v5108_v59  ;;  %v2817_v10 = vmul.f32 %v2809_v18, %v5110_v46 }
0x1362   : > { %v2810_v11 = vmul.f32 %v5118_v24, %v5118_v24  ;;  %v2812_v12 = vmul.f32 %v5120_v1, %v5120_v1  ;;  %v5128_v13 = vadd.f32 %v2760_v2, %v2547_v48  ;;  %v5130_v4 = vadd.f32 %v2803_v3, %v2555_v49 }
0x1363   : > { %v2830_v14 = vadd.f32 %v2822_v7, %v5100_v52  ;;  %v2832_v17 = vadd.f32 %v2824_v8, %v5102_v56  ;;  %v2823_v19 = vmul.f32 0.044715, %v2815_v9  ;;  %v2825_v20 = vmul.f32 0.044715, %v2817_v10 }
0x1364   : > { %v2818_v21 = vmul.f32 %v2810_v11, %v5118_v24  ;;  %v2820_v22 = vmul.f32 %v2812_v12, %v5120_v1  ;;  %v2811_v23 = vmul.f32 %v5128_v13, %v5128_v13  ;;  %v2813_v27 = vmul.f32 %v5130_v4, %v5130_v4 }
0x1365   : > { %v2838_v26 = vmul.f32 0.7978846, %v2830_v14  ;;  %v2840_v28 = vmul.f32 0.7978846, %v2832_v17  ;;  %v2831_v29 = vadd.f32 %v2823_v19, %v5108_v59  ;;  %v2833_v31 = vadd.f32 %v2825_v20, %v5110_v46 }
0x1366   : > { %v2826_v32 = vmul.f32 0.044715, %v2818_v21  ;;  %v2828_v33 = vmul.f32 0.044715, %v2820_v22  ;;  %v2819_v53 = vmul.f32 %v2811_v23, %v5128_v13  ;;  %v2821_v34 = vmul.f32 %v2813_v27, %v5130_v4 }
0x1367   : > { %4330 = vtanh.f32 %v2838_v26  ;;  %v2839_v58 = vmul.f32 0.7978846, %v2831_v29  ;;  %v2841_v35 = vmul.f32 0.7978846, %v2833_v31 }
0x1368   : > { %4332 = vtanh.f32 %v2840_v28  ;;  %v2834_v5 = vadd.f32 %v2826_v32, %v5118_v24  ;;  %v2836_v54 = vadd.f32 %v2828_v33, %v5120_v1  ;;  %v2827_v60 = vmul.f32 0.044715, %v2819_v53  ;;  %v3628_v53 = vld [vmem:[%s5221_s9 + $0x1] ss:$0 sm:$0xff] }
0x1369   : > { %4334 = vtanh.f32 %v2839_v58  ;;  %v2829_v61 = vmul.f32 0.044715, %v2821_v34 }
0x136a   : > { %4336 = vtanh.f32 %v2841_v35  ;;  %v2842_v55 = vmul.f32 0.7978846, %v2834_v5  ;;  %v2844_v6 = vmul.f32 0.7978846, %v2836_v54  ;;  %v2835_v15 = vadd.f32 %v2827_v60, %v5128_v13 }
0x136b   : > { %v2837_v16 = vadd.f32 %v2829_v61, %v5130_v4 }
0x136c   : > { %4338 = vtanh.f32 %v2842_v55  ;;  %v2843_v36 = vmul.f32 0.7978846, %v2835_v15 }
0x136d   : > { %4340 = vtanh.f32 %v2844_v6  ;;  %v2845_v37 = vmul.f32 0.7978846, %v2837_v16 }
0x136e   : > { %4342 = vtanh.f32 %v2843_v36 }
0x136f   : > { %4344 = vtanh.f32 %v2845_v37 }
0x1374   : > { %v4331_v38 = vpop.eup %4330 }
0x1375   : > { %v4333_v39 = vpop.eup %4332  ;;  %v2854_v50 = vadd.f32 1.0, %v4331_v38 }
0x1376   : > { %v4335_v40 = vpop.eup %4334  ;;  %v2856_v45 = vadd.f32 1.0, %v4333_v39 }
0x1377   : > { %v4337_v41 = vpop.eup %4336  ;;  %v2855_v48 = vadd.f32 1.0, %v4335_v40  ;;  %v2862_v18 = vmul.f32 0.5, %v2854_v50 }
0x1378   : > { %v2857_v51 = vadd.f32 1.0, %v4337_v41  ;;  %v2864_v8 = vmul.f32 0.5, %v2856_v45 }
0x1379   : > { %v4339_v49 = vpop.eup %4338  ;;  %v2863_v0 = vmul.f32 0.5, %v2855_v48  ;;  %v2870_v19 = vmul.f32 %v2862_v18, %v5100_v52 }
0x137a   : > { %v4341_v57 = vpop.eup %4340  ;;  %v2858_v43 = vadd.f32 1.0, %v4339_v49  ;;  %v2865_v7 = vmul.f32 0.5, %v2857_v51  ;;  %v2872_v22 = vmul.f32 %v2864_v8, %v5102_v56 }
0x137b   : > { %v4343_v44 = vpop.eup %4342  ;;  %v2860_v42 = vadd.f32 1.0, %v4341_v57  ;;  %v2871_v14 = vmul.f32 %v2863_v0, %v5108_v59 }
0x137c   : > { %v4345_v47 = vpop.eup %4344  ;;  %v2866_v62 = vmul.f32 0.5, %v2858_v43  ;;  %v2859_v63 = vadd.f32 1.0, %v4343_v44  ;;  %v2873_v20 = vmul.f32 %v2865_v7, %v5110_v46 }
0x137d   : > { %v2868_v2 = vmul.f32 0.5, %v2860_v42  ;;  %v2861_v3 = vadd.f32 1.0, %v4345_v47 }
0x137e   : > { %v2867_v9 = vmul.f32 0.5, %v2859_v63  ;;  %v2874_v10 = vmul.f32 %v2866_v62, %v5118_v24 }
0x137f   : > { %v2869_v11 = vmul.f32 0.5, %v2861_v3  ;;  %v2876_v12 = vmul.f32 %v2868_v2, %v5120_v1 }
0x1380   : > { %v2875_v17 = vmul.f32 %v2867_v9, %v5128_v13  ;;  %v2878_v26 = vpack.c.bf16 %v2874_v10, %v2870_v19 }
0x1381   : > { %v2877_v21 = vmul.f32 %v2869_v11, %v5130_v4  ;;  %v2880_v24 = vpack.c.bf16 %v2876_v12, %v2872_v22 }
0x1382   : > { %v2879_v23 = vpack.c.bf16 %v2875_v17, %v2871_v14 }
0x1383   : > { %v2881_v27 = vpack.c.bf16 %v2877_v21, %v2873_v20 }
0x1384   : > { %3171 = vmatprep.mubr.bf16.mxu1 %v2879_v23 }
0x1385   : > { %3212 = vmatprep.mubr.bf16.mxu0 %v2881_v27  ;;  %3172 = vmatmul.mubr.bf16.vlgmr.msra.gmra.mxu1 %v2878_v26 }
0x1386   : > { %3213 = vmatmul.mubr.bf16.vlgmr.msra.gmra.mxu0 %v2880_v24 }
0x1445   : > { %v3749_v1 = vpop.f32.mrf.mxu1 }
0x1446   : > { %v3771_v59 = vpop.f32.mrf.mxu0 }
0x1447   : > { %v3750_v28 = vpop.f32.mrf.mxu1 }
0x1448   : > { %v3751_v13 = vadd.f32 %v3750_v28, %v3749_v1  ;;  %v3772_v29 = vpop.f32.mrf.mxu0 }
0x1449   : > { %v3773_v52 = vadd.f32 %v3772_v29, %v3771_v59  ;;  %v3752_v31 = vpop.f32.mrf.mxu1 }
0x144a   : > { %v3774_v46 = vpop.f32.mrf.mxu0 }
0x144b   : > { %v3215_v32 = vadd.f32 %v3773_v52, %v3751_v13  ;;  %v3753_v4 = vpop.f32.mrf.mxu1 }
0x144c   : > { %v3754_v33 = vadd.f32 %v3753_v4, %v3752_v31  ;;  %v3775_v56 = vpop.f32.mrf.mxu0 }
0x144d   : > { %v3221_v34 = vadd.f32 %v3215_v32, %v5078_v25  ;;  %v3776_v58 = vadd.f32 %v3775_v56, %v3774_v46  ;;  %v3246_v25 = vstv %s3629_s12 }
0x144f   : > { %v3218_v35 = vadd.f32 %v3776_v58, %v3754_v33  ;;  %v3231_v5 = vadd.f32 %v3628_v53, %v3221_v34 }
0x1451   : > { %v3222_v54 = vadd.f32 %v3218_v35, %v5083_v30  ;;  %v3234_v60 = vmul.f32 %v3231_v5, %v3231_v5 }
0x1453   : > { %3236 = vadd.xlane.f32.xlu0 %v3234_v60  ;;  %v3232_v61 = vadd.f32 %v3628_v53, %v3222_v54 }
0x1455   : > { %v3235_v55 = vmul.f32 %v3232_v61, %v3232_v61 }
0x1457   : > { %3238 = vadd.xlane.f32.xlu1 %v3235_v55 }
0x14dc   : > { %v3237_v6 = vpop.xlane.xlu0 %3236 }
0x14dd   : > { %v3240_v15 = vmul.f32 0.0078125, %v3237_v6 }
0x14df   : > { %v3242_v16 = vmax.f32 %v3240_v15, 1e-10 }
0x14e0   : > { %v3239_v36 = vpop.xlane.xlu1 %3238 }
0x14e1   : > { %4346 = vrsqrt.f32 %v3242_v16  ;;  %v3241_v37 = vmul.f32 0.0078125, %v3239_v36 }
0x14e3   : > { %v3243_v38 = vmax.f32 %v3241_v37, 1e-10 }
0x14e5   : > { %4348 = vrsqrt.f32 %v3243_v38 }
0x14ee   : > { %v4347_v39 = vpop.eup %4346 }
0x14ef   : > { %v3247_v30 = vmul.f32 %v4347_v39, %v3246_v25 }
0x14f1   : > { %v3249_v40 = vmul.f32 %v3247_v30, %v3231_v5 }
0x14f2   : > { %v4349_v41 = vpop.eup %4348 }
0x14f3   : > { %v3248_v48 = vmul.f32 %v4349_v41, %v3246_v25  ;;  %3251 = vst [vmem:[%s458_s17] sm:$0xff] %v3249_v40 }
0x14f5   : > { %v3250_v49 = vmul.f32 %v3248_v48, %v3232_v61 }
0x14f7   : > { %3252 = vst [vmem:[%s458_s17 + $0x8] sm:$0xff] %v3250_v49 }
0x14f8   : > { %4509 = shalt.err (!%p4506_p2)
}
0x14f9   : > { %s4510_s18 = scalar_lea.hbm %s5167_s29, 256  ;;  %s4514_s12 = scalar_lea.hbm %s5222_s10, 512 }
0x14fa   : > { %p4511_p3 = scmp.ne.s32.totalorder %s5167_s29, %s4510_s18  ;;  %p4515_p0 = scmp.lt.s32.totalorder %s5167_s29, %s5222_s10 }
0x14fb   : > { %p4516_p8 = scmp.lt.s32.totalorder %s4514_s12, %s4510_s18 }
0x14fc   : > { %p4512_p10 = pnand %p4511_p3, %p5249_p4 }
0x14fd   : > { %p4517_p9 = por %p4516_p8, %p4515_p0 }
0x14fe   : > { %p4513_p6 = pneg %p4512_p10 }
0x1500   : > { %p4518_p11 = pnand %p4517_p9, %p4513_p6 }
0x1502   : > { %4521 = shalt.err (!%p4518_p11)
}
0x1503   : > { %s4593_s0 = smov 128   ;;  %s4594_s20 = smov 8  }
0x1504   : > { %3927 = dma.vmem_to_hbm [thread:$0]  (%p5249_p4), %s5169_s11, 256, %s5167_s29, %s3254_s21, %s4593_s0, %s4593_s0, %s4594_s20  }
0x1505 PF: > { %s3282_s19 = sand.u32 1, %s4560_s13   ;;  %p5250_p12 = scmp.ne.s32.totalorder %s5239_s30, 0 }
0x1506   : > { %p5251_p7 = scmp.ge.s32.totalorder %s4572_s16, 2  ;;  %s3283_s6 = scalar_lea.sflag [#allocation4], %s3282_s19 }
0x1508   : > { %p3950_p5 = pnand %p5251_p7, %p5250_p12 }
0x150a   : > { %p3951_p1 = pneg %p3950_p5 }
0x150c   : > { %4555 = dma.done.wait (%p3951_p1), %s3283_s6, 256  }
0x150d   : > { %4557 = vsyncadd (%p3951_p1), %s3283_s6, 4294967040  ;;  %p26_p13 = scmp.ge.s32.totalorder %s4730_s23, 4   ;;  %s5252_s13 = smov %s4564_s14 }
0x150e   : > { %s5253_s14 = smov %s4568_s15  ;;  %s5254_s15 = smov %s4742_s27 }
0x150f   : > { %s5255_s16 = smov %s4730_s23  ;;  %28 = sbr.rel (!%p26_p13) target bundleno = 13 (0xd), region = 136 }
0x1514   :  { %3288 = vsyncpa [#allocation3], 1 }
0x1515   :  { %3290 = vsyncpa [#allocation3 + $0x1], 1 }
0x1516   :  { %3291 = vsyncpa [#allocation8], 1 }
0x1517   :  { %3292 = vsyncpa [#allocation11], 1 }
0x1518   :  { %3293 = vsyncpa [#allocation4], 1 }
0x1519   :  { %3295 = vsyncpa [#allocation4 + $0x1], 1 }
0x151a   :  { %3296 = vsyncpa [#allocation5], 1 }
0x151b   :  { %3298 = vsyncpa [#allocation5 + $0x1], 1 }

</bundles_post_ra>
